<compile_context>
chip_gen: v5e
topology: v5e:2x2
jax: 0.10.0
libtpu: 0.0.40
codegen_flags: <defaults>
</compile_context>

<pallas_src>
import math
import functools

import jax
import jax.numpy as jnp
from jax.experimental import pallas as pl
from jax.experimental.pallas import tpu as pltpu


# ----------------------------- kernel helpers -----------------------------

def _rmsnorm(x, w, eps=1e-6):
    # LlamaRMSNorm: x * rsqrt(mean(x^2, -1) + eps) * weight   (f32)
    var = jnp.mean(x * x, axis=-1, keepdims=True)
    return (x * jax.lax.rsqrt(var + eps)) * w


def _gelu_exact(x):
    # nn.GELU() default == exact (erf) GELU, kept in f32
    return 0.5 * x * (1.0 + jax.lax.erf(x * (1.0 / math.sqrt(2.0))))


def _round_up(n, m):
    return (n + m - 1) // m * m


def _vmem_limit_bytes():
    # Generation-aware VMEM budget (v5e/v6e: 128 MiB physical, v7x: 64 MiB).
    try:
        cap = pltpu.get_tpu_info().vmem_capacity_bytes
        return min(int(cap * 3 // 4), 100 * 1024 * 1024)
    except Exception:  # pragma: no cover - conservative fallback
        return 64 * 1024 * 1024


# ----------------------------- Pallas kernel -------------------------------

def fused_forward_kernel(x_ref, pos_ref,
                         ln1_ref, wqkv_ref, bqkv_ref, wo_ref, bo_ref,
                         ln2_ref, wfc_ref, bfc_ref, wp_ref, bp_ref,
                         fcln_ref, wout_ref, bout_ref,
                         out_ref,
                         resid_ref, yattn_ref,
                         *, num_head, head_dim):
    """One grid step = (batch block b, layer l).

    The f32 residual stream lives in `resid_ref` (VMEM scratch, persistent
    across grid steps; re-seeded at l==0 of each batch block).  The head
    output is written only at the last layer.  NOTE: relies on row-major grid
    order with the layer axis innermost ("arbitrary")."""
    l = pl.program_id(1)
    n_layers = pl.num_programs(1)

    Bb, T, C = x_ref.shape
    M = Bb * T
    out_pad = out_ref.shape[-1]

    # Seed the resident residual stream (embeddings + positional) at layer 0.
    @pl.when(l == 0)
    def _():
        resid_ref[...] = (x_ref[...] + pos_ref[...]).reshape(M, C)

    x = resid_ref[...]                                  # (Bb*T, C) f32

    # ---- attention sublayer:  x = x + c_proj(attn(ln_1(x))) ----
    h = _rmsnorm(x, ln1_ref[0])
    qkv = jnp.dot(h.astype(jnp.bfloat16), wqkv_ref[0],
                  preferred_element_type=jnp.float32) + bqkv_ref[0]   # (M, 3C) f32

    scale = 1.0 / math.sqrt(head_dim)
    row = jax.lax.broadcasted_iota(jnp.int32, (T, T), 0)
    col = jax.lax.broadcasted_iota(jnp.int32, (T, T), 1)
    causal = col <= row
    dn_qkt = (((1,), (1,)), ((), ()))   # q @ k^T, no materialized transpose

    # TODO(synk): flash-tile over query/KV blocks + lane-aligned (128) head_dim
    # for realistic sequence lengths / head sizes.
    for b in range(Bb):                      # static batch-block loop
        rows = slice(b * T, (b + 1) * T)
        qb = qkv[rows, 0 * C:1 * C].astype(jnp.bfloat16)
        kb = qkv[rows, 1 * C:2 * C].astype(jnp.bfloat16)
        vb = qkv[rows, 2 * C:3 * C].astype(jnp.bfloat16)
        for hi in range(num_head):           # static head loop
            sl = slice(hi * head_dim, (hi + 1) * head_dim)
            s = jax.lax.dot_general(qb[:, sl], kb[:, sl], dn_qkt,
                                    preferred_element_type=jnp.float32) * scale
            s = jnp.where(causal, s, -1e30)
            s = s - jnp.max(s, axis=-1, keepdims=True)
            p = jnp.exp(s)
            p = p * pl.reciprocal(jnp.sum(p, axis=-1, keepdims=True), approx=True)
            yattn_ref[rows, sl] = jnp.dot(p.astype(jnp.bfloat16), vb[:, sl],
                                          preferred_element_type=jnp.float32)

    # ONE full-depth (M, C) @ (C, C) output projection for all heads / rows.
    x = x + jnp.dot(yattn_ref[...].astype(jnp.bfloat16), wo_ref[0],
                    preferred_element_type=jnp.float32) + bo_ref[0]

    # ---- MLP sublayer:  x = x + c_proj(gelu(c_fc(ln_2(x)))) ----
    h2 = _rmsnorm(x, ln2_ref[0])
    f = jnp.dot(h2.astype(jnp.bfloat16), wfc_ref[0],
                preferred_element_type=jnp.float32) + bfc_ref[0]
    f = _gelu_exact(f)
    f = jnp.dot(f.astype(jnp.bfloat16), wp_ref[0],
                preferred_element_type=jnp.float32) + bp_ref[0]
    x = x + f

    resid_ref[...] = x

    # ---- fused head (fc_ln + fc_out), lane-dense padded store, last layer ----
    @pl.when(l == n_layers - 1)
    def _():
        hh = _rmsnorm(x, fcln_ref[...])
        out = jnp.dot(hh.astype(jnp.bfloat16), wout_ref[...],
                      preferred_element_type=jnp.float32) + bout_ref[...]
        out_ref[...] = out.reshape(Bb, T, out_pad)


# ----------------------------- wrapper --------------------------------------

def jpt1_forward(x_ids, params, num_head, batch_block=None):
    """Full JPT1Quantized.forward: embeddings -> transformer -> fc_ln -> fc_out."""
    B, T = x_ids.shape
    C = params["tok_emb"].shape[1]
    lp = params["layers"]
    L = lp["wqkv"].shape[0]
    F = lp["wfc"].shape[2]
    out_pad = params["w_out"].shape[1]

    Bb = B if batch_block is None else batch_block
    assert B % Bb == 0, "batch_block must divide B"

    # Token-embedding gather kept in XLA (glue).
    # TODO(synk): fold the gather into the kernel via scalar-prefetched ids.
    tok_emb = params["tok_emb"][x_ids]                    # (B, T, C) f32
    pos_emb = params["pos_emb"][None, :T, :]              # (1, T, C), added in-kernel

    xmap = lambda b, l: (b, 0, 0)       # activations / head output: resident across L
    wmap = lambda b, l: (l, 0, 0)       # per-layer stacked weights
    cmap3 = lambda b, l: (0, 0, 0)      # grid-invariant 3-D
    cmap2 = lambda b, l: (0, 0)         # grid-invariant 2-D

    in_specs = [
        pl.BlockSpec((Bb, T, C), xmap),            # token embeddings
        pl.BlockSpec((1, T, C), cmap3),            # positional embeddings
        pl.BlockSpec((1, 1, C), wmap),             # ln_1 weight
        pl.BlockSpec((1, C, 3 * C), wmap),         # c_attn weight (bf16)
        pl.BlockSpec((1, 1, 3 * C), wmap),         # c_attn bias
        pl.BlockSpec((1, C, C), wmap),             # attn c_proj weight (bf16)
        pl.BlockSpec((1, 1, C), wmap),             # attn c_proj bias
        pl.BlockSpec((1, 1, C), wmap),             # ln_2 weight
        pl.BlockSpec((1, C, F), wmap),             # mlp c_fc weight (bf16)
        pl.BlockSpec((1, 1, F), wmap),             # mlp c_fc bias
        pl.BlockSpec((1, F, C), wmap),             # mlp c_proj weight (bf16)
        pl.BlockSpec((1, 1, C), wmap),             # mlp c_proj bias
        pl.BlockSpec((1, C), cmap2),               # fc_ln weight
        pl.BlockSpec((C, out_pad), cmap2),         # fc_out weight (bf16, lane-padded)
        pl.BlockSpec((1, out_pad), cmap2),         # fc_out bias (padded)
    ]

    kernel = functools.partial(fused_forward_kernel,
                               num_head=num_head, head_dim=C // num_head)

    logits_pad = pl.pallas_call(
        kernel,
        out_shape=jax.ShapeDtypeStruct((B, T, out_pad), jnp.float32),
        grid=(B // Bb, L),
        in_specs=in_specs,
        out_specs=pl.BlockSpec((Bb, T, out_pad), xmap),
        scratch_shapes=[
            pltpu.VMEM((Bb * T, C), jnp.float32),   # resident residual stream
            pltpu.VMEM((Bb * T, C), jnp.float32),   # per-head attention outputs
        ],
        compiler_params=pltpu.CompilerParams(
            # Layer axis carries the resident residual -> "arbitrary".  Batch
            # axis kept "arbitrary" so megacore doesn't double weight HBM
            # traffic; flip to "parallel" for large batches on v7x.
            dimension_semantics=("arbitrary", "arbitrary"),
            vmem_limit_bytes=_vmem_limit_bytes()),
    )(tok_emb, pos_emb,
      lp["ln1"], lp["wqkv"], lp["bqkv"], lp["wo"], lp["bo"],
      lp["ln2"], lp["wfc"], lp["bfc"], lp["wp"], lp["bp"],
      params["fc_ln_w"], params["w_out"], params["b_out"])

    return logits_pad[..., :params["out_dim"]]


# ----------------------------- parameter init ------------------------------

def init_params(key, *, vocab_size, seq_len, embed_dim, num_head, num_layers, out_dim):
    std = 0.02
    std_res = 0.02 * (2 * num_layers) ** (-0.5)   # SCALE_RESIDUAL projections
    C = embed_dim
    F = 4 * C
    L = num_layers
    out_pad = _round_up(out_dim, 128)             # lane-dense fc_out store

    keys = iter(jax.random.split(key, 3 + 4 * L))
    nrm = lambda k, shape, s: s * jax.random.normal(k, shape, jnp.float32)

    tok_emb = nrm(next(keys), (vocab_size, C), 0.02)
    pos_emb = nrm(next(keys), (seq_len, C), 0.02)

    wqkv_l, wo_l, wfc_l, wp_l = [], [], [], []
    for _ in range(L):
        wqkv_l.append(nrm(next(keys), (C, 3 * C), std))      # c_attn
        wo_l.append(nrm(next(keys), (C, C), std_res))        # attn c_proj
        wfc_l.append(nrm(next(keys), (C, F), std))           # mlp c_fc
        wp_l.append(nrm(next(keys), (F, C), std_res))        # mlp c_proj

    # model_type == COS_SIM: fc_out is Linear(embed_dim, token_space_dim)
    w_out = nrm(next(keys), (C, out_dim), std)
    w_out_pad = jnp.zeros((C, out_pad), jnp.float32).at[:, :out_dim].set(w_out)

    return {
        "tok_emb": tok_emb,
        "pos_emb": pos_emb,
        "layers": {
            # matmul weights cast once to bf16; biases / RMSNorm gains stay f32
            "ln1":  jnp.ones((L, 1, C), jnp.float32),
            "wqkv": jnp.stack(wqkv_l).astype(jnp.bfloat16),
            "bqkv": jnp.zeros((L, 1, 3 * C), jnp.float32),
            "wo":   jnp.stack(wo_l).astype(jnp.bfloat16),
            "bo":   jnp.zeros((L, 1, C), jnp.float32),
            "ln2":  jnp.ones((L, 1, C), jnp.float32),
            "wfc":  jnp.stack(wfc_l).astype(jnp.bfloat16),
            "bfc":  jnp.zeros((L, 1, F), jnp.float32),
            "wp":   jnp.stack(wp_l).astype(jnp.bfloat16),
            "bp":   jnp.zeros((L, 1, C), jnp.float32),
        },
        "fc_ln_w": jnp.ones((1, C), jnp.float32),
        "w_out": w_out_pad.astype(jnp.bfloat16),
        "b_out": jnp.zeros((1, out_pad), jnp.float32),
        "out_dim": out_dim,
    }


# ----------------------------- main ----------------------------------------

if __name__ == "__main__":
    # small, forward-consistent shapes
    B, T = 2, 8
    seq_len = 8
    embed_dim = 32
    num_head = 4
    num_layers = 2
    vocab_size = 64
    token_space_dim = embed_dim            # lookup_embeddings.weight.shape[1]

    key = jax.random.PRNGKey(0)
    k_params, k_ids = jax.random.split(key)

    params = init_params(k_params,
                         vocab_size=vocab_size, seq_len=seq_len,
                         embed_dim=embed_dim, num_head=num_head,
                         num_layers=num_layers, out_dim=token_space_dim)

    x_ids = jax.random.randint(k_ids, (B, T), 0, vocab_size, dtype=jnp.int32)

    out = jpt1_forward(x_ids, params, num_head)    # (B, T, token_space_dim)
    jax.block_until_ready(out)

    assert out.shape == (B, T, token_space_dim)
    assert bool(jnp.all(jnp.isfinite(out)))
    print("KERNEL_OK")
</pallas_src>

<mosaic_0001>
module attributes {stable_mosaic.version = 11 : i64} {
  func.func @fused_forward_kernel(%arg0: i32, %arg1: i32, %arg2: memref<2x8x32xf32, #tpu.memory_space<vmem>>, %arg3: memref<1x8x32xf32, #tpu.memory_space<vmem>>, %arg4: memref<1x1x32xf32, #tpu.memory_space<vmem>>, %arg5: memref<1x32x96xbf16, #tpu.memory_space<vmem>>, %arg6: memref<1x1x96xf32, #tpu.memory_space<vmem>>, %arg7: memref<1x32x32xbf16, #tpu.memory_space<vmem>>, %arg8: memref<1x1x32xf32, #tpu.memory_space<vmem>>, %arg9: memref<1x1x32xf32, #tpu.memory_space<vmem>>, %arg10: memref<1x32x128xbf16, #tpu.memory_space<vmem>>, %arg11: memref<1x1x128xf32, #tpu.memory_space<vmem>>, %arg12: memref<1x128x32xbf16, #tpu.memory_space<vmem>>, %arg13: memref<1x1x32xf32, #tpu.memory_space<vmem>>, %arg14: memref<1x32xf32, #tpu.memory_space<vmem>>, %arg15: memref<32x128xbf16, #tpu.memory_space<vmem>>, %arg16: memref<1x128xf32, #tpu.memory_space<vmem>>, %arg17: memref<2x8x128xf32, #tpu.memory_space<vmem>>, %arg18: memref<16x32xf32, #tpu.memory_space<vmem>>, %arg19: memref<16x32xf32, #tpu.memory_space<vmem>>) attributes {dimension_semantics = [#tpu.dimension_semantics<arbitrary>, #tpu.dimension_semantics<arbitrary>], iteration_bounds = array<i64: 1, 2>, scalar_prefetch = 0 : i64, scratch_operands = 2 : i64, tpu.core_type = #tpu.core_type<tc>, window_params = [{transform_indices = @transform_0, window_bounds = array<i64: 2, 8, 32>}, {pipeline_mode = #tpu.pipeline_mode<synchronous>, transform_indices = @transform_1, window_bounds = array<i64: 1, 8, 32>}, {transform_indices = @transform_2, window_bounds = array<i64: 1, 1, 32>}, {transform_indices = @transform_3, window_bounds = array<i64: 1, 32, 96>}, {transform_indices = @transform_4, window_bounds = array<i64: 1, 1, 96>}, {transform_indices = @transform_5, window_bounds = array<i64: 1, 32, 32>}, {transform_indices = @transform_6, window_bounds = array<i64: 1, 1, 32>}, {transform_indices = @transform_7, window_bounds = array<i64: 1, 1, 32>}, {transform_indices = @transform_8, window_bounds = array<i64: 1, 32, 128>}, {transform_indices = @transform_9, window_bounds = array<i64: 1, 1, 128>}, {transform_indices = @transform_10, window_bounds = array<i64: 1, 128, 32>}, {transform_indices = @transform_11, window_bounds = array<i64: 1, 1, 32>}, {pipeline_mode = #tpu.pipeline_mode<synchronous>, transform_indices = @transform_12, window_bounds = array<i64: 1, 32>}, {pipeline_mode = #tpu.pipeline_mode<synchronous>, transform_indices = @transform_13, window_bounds = array<i64: 32, 128>}, {pipeline_mode = #tpu.pipeline_mode<synchronous>, transform_indices = @transform_14, window_bounds = array<i64: 1, 128>}, {transform_indices = @transform_15, window_bounds = array<i64: 2, 8, 128>}]} {
    %c0_i32 = arith.constant 0 : i32
    %0 = arith.cmpi eq, %arg1, %c0_i32 : i32
    %1 = arith.extui %0 : i1 to i32
    %c0_i32_0 = arith.constant 0 : i32
    %2 = arith.cmpi ne, %1, %c0_i32_0 : i32
    scf.if %2 {
      %c0_110 = arith.constant 0 : index
      %c0_111 = arith.constant 0 : index
      %c0_112 = arith.constant 0 : index
      %262 = vector.load %arg2[%c0_110, %c0_111, %c0_112] : memref<2x8x32xf32, #tpu.memory_space<vmem>>, vector<2x8x32xf32>
      %c0_113 = arith.constant 0 : index
      %c0_114 = arith.constant 0 : index
      %c0_115 = arith.constant 0 : index
      %263 = vector.load %arg3[%c0_113, %c0_114, %c0_115] : memref<1x8x32xf32, #tpu.memory_space<vmem>>, vector<1x8x32xf32>
      %264 = vector.broadcast %263 : vector<1x8x32xf32> to vector<2x8x32xf32>
      %265 = arith.addf %262, %264 : vector<2x8x32xf32>
      %266 = vector.shape_cast %265 : vector<2x8x32xf32> to vector<16x32xf32>
      %c0_116 = arith.constant 0 : index
      %c0_117 = arith.constant 0 : index
      %267 = vector.load %arg18[%c0_116, %c0_117] : memref<16x32xf32, #tpu.memory_space<vmem>>, vector<16x32xf32>
      tpu.vector_store %arg18[%c0_116, %c0_117], %266 {strides = array<i32>} : memref<16x32xf32, #tpu.memory_space<vmem>>, vector<16x32xf32>,
    } else {
    }
    %c0 = arith.constant 0 : index
    %c0_1 = arith.constant 0 : index
    %3 = vector.load %arg18[%c0, %c0_1] : memref<16x32xf32, #tpu.memory_space<vmem>>, vector<16x32xf32>
    %c0_2 = arith.constant 0 : index
    %c0_3 = arith.constant 0 : index
    %c0_4 = arith.constant 0 : index
    %4 = vector.load %arg4[%c0_2, %c0_3, %c0_4] : memref<1x1x32xf32, #tpu.memory_space<vmem>>, vector<1x1x32xf32>
    %5 = vector.shape_cast %4 : vector<1x1x32xf32> to vector<1x32xf32>
    %6 = arith.mulf %3, %3 : vector<16x32xf32>
    %cst = arith.constant dense<0.000000e+00> : vector<16xf32>
    %7 = vector.multi_reduction <add>, %6, %cst [1] : vector<16x32xf32> to vector<16xf32>
    %8 = vector.shape_cast %7 : vector<16xf32> to vector<16x1xf32>
    %cst_5 = arith.constant 3.200000e+01 : f32
    %9 = vector.broadcast %cst_5 : f32 to vector<16x1xf32>
    %10 = arith.divf %8, %9 : vector<16x1xf32>
    %cst_6 = arith.constant 9.99999997E-7 : f32
    %11 = vector.broadcast %cst_6 : f32 to vector<16x1xf32>
    %12 = arith.addf %10, %11 : vector<16x1xf32>
    %13 = math.rsqrt %12 : vector<16x1xf32>
    %14 = vector.broadcast %13 : vector<16x1xf32> to vector<16x32xf32>
    %15 = arith.mulf %3, %14 : vector<16x32xf32>
    %16 = vector.broadcast %5 : vector<1x32xf32> to vector<16x32xf32>
    %17 = arith.mulf %15, %16 : vector<16x32xf32>
    %18 = arith.truncf %17 : vector<16x32xf32> to vector<16x32xbf16>
    %c0_7 = arith.constant 0 : index
    %c0_8 = arith.constant 0 : index
    %c0_9 = arith.constant 0 : index
    %19 = vector.load %arg5[%c0_7, %c0_8, %c0_9] : memref<1x32x96xbf16, #tpu.memory_space<vmem>>, vector<1x32x96xbf16>
    %20 = vector.shape_cast %19 : vector<1x32x96xbf16> to vector<32x96xbf16>
    %cst_10 = arith.constant dense<0.000000e+00> : vector<16x96xf32>
    %21 = tpu.matmul %18, %20, %cst_10 {dimension_numbers = #tpu.dot_dimension_numbers<[1], [0], [0], [1], [0, 0, 1, 1], [], []>} : vector<16x32xbf16>, vector<32x96xbf16>, vector<16x96xf32> -> vector<16x96xf32>
    %c0_11 = arith.constant 0 : index
    %c0_12 = arith.constant 0 : index
    %c0_13 = arith.constant 0 : index
    %22 = vector.load %arg6[%c0_11, %c0_12, %c0_13] : memref<1x1x96xf32, #tpu.memory_space<vmem>>, vector<1x1x96xf32>
    %23 = vector.shape_cast %22 : vector<1x1x96xf32> to vector<1x96xf32>
    %24 = vector.broadcast %23 : vector<1x96xf32> to vector<16x96xf32>
    %25 = arith.addf %21, %24 : vector<16x96xf32>
    %26 = tpu.iota {dimensions = array<i32: 0>} : vector<8x8xi32>
    %27 = tpu.iota {dimensions = array<i32: 1>} : vector<8x8xi32>
    %28 = arith.cmpi sle, %27, %26 : vector<8x8xi32>
    %29 = vector.extract_strided_slice %25 {offsets = [0, 0], sizes = [8, 32], strides = [1, 1]} : vector<16x96xf32> to vector<8x32xf32>
    %30 = arith.truncf %29 : vector<8x32xf32> to vector<8x32xbf16>
    %31 = vector.extract_strided_slice %25 {offsets = [0, 32], sizes = [8, 32], strides = [1, 1]} : vector<16x96xf32> to vector<8x32xf32>
    %32 = arith.truncf %31 : vector<8x32xf32> to vector<8x32xbf16>
    %33 = vector.extract_strided_slice %25 {offsets = [0, 64], sizes = [8, 32], strides = [1, 1]} : vector<16x96xf32> to vector<8x32xf32>
    %34 = arith.truncf %33 : vector<8x32xf32> to vector<8x32xbf16>
    %35 = vector.extract_strided_slice %30 {offsets = [0, 0], sizes = [8, 8], strides = [1, 1]} : vector<8x32xbf16> to vector<8x8xbf16>
    %36 = vector.extract_strided_slice %32 {offsets = [0, 0], sizes = [8, 8], strides = [1, 1]} : vector<8x32xbf16> to vector<8x8xbf16>
    %cst_14 = arith.constant dense<0.000000e+00> : vector<8x8xf32>
    %37 = tpu.matmul %35, %36, %cst_14 {dimension_numbers = #tpu.dot_dimension_numbers<[1], [1], [0], [0], [0, 0, 1, 0], [], []>} : vector<8x8xbf16>, vector<8x8xbf16>, vector<8x8xf32> -> vector<8x8xf32>
    %cst_15 = arith.constant 0.353553385 : f32
    %38 = vector.broadcast %cst_15 : f32 to vector<8x8xf32>
    %39 = arith.mulf %37, %38 : vector<8x8xf32>
    %cst_16 = arith.constant -1.000000e+30 : f32
    %40 = vector.broadcast %cst_16 : f32 to vector<8x8xf32>
    %41 = arith.select %28, %39, %40 : vector<8x8xi1>, vector<8x8xf32>
    %cst_17 = arith.constant dense<0xFF800000> : vector<8xf32>
    %42 = vector.multi_reduction <maximumf>, %41, %cst_17 [1] : vector<8x8xf32> to vector<8xf32>
    %43 = vector.shape_cast %42 : vector<8xf32> to vector<8x1xf32>
    %44 = vector.broadcast %43 : vector<8x1xf32> to vector<8x8xf32>
    %45 = arith.subf %41, %44 : vector<8x8xf32>
    %46 = math.exp %45 : vector<8x8xf32>
    %cst_18 = arith.constant dense<0.000000e+00> : vector<8xf32>
    %47 = vector.multi_reduction <add>, %46, %cst_18 [1] : vector<8x8xf32> to vector<8xf32>
    %48 = vector.shape_cast %47 : vector<8xf32> to vector<8x1xf32>
    %49 = tpu.reciprocal %48 {approx = true} : vector<8x1xf32> -> vector<8x1xf32>
    %50 = vector.broadcast %49 : vector<8x1xf32> to vector<8x8xf32>
    %51 = arith.mulf %46, %50 : vector<8x8xf32>
    %52 = arith.truncf %51 : vector<8x8xf32> to vector<8x8xbf16>
    %53 = vector.extract_strided_slice %34 {offsets = [0, 0], sizes = [8, 8], strides = [1, 1]} : vector<8x32xbf16> to vector<8x8xbf16>
    %cst_19 = arith.constant dense<0.000000e+00> : vector<8x8xf32>
    %54 = tpu.matmul %52, %53, %cst_19 {dimension_numbers = #tpu.dot_dimension_numbers<[1], [0], [0], [1], [0, 0, 1, 1], [], []>} : vector<8x8xbf16>, vector<8x8xbf16>, vector<8x8xf32> -> vector<8x8xf32>
    %c0_20 = arith.constant 0 : index
    %c0_21 = arith.constant 0 : index
    %55 = vector.load %arg19[%c0_20, %c0_21] : memref<16x32xf32, #tpu.memory_space<vmem>>, vector<8x8xf32>
    tpu.vector_store %arg19[%c0_20, %c0_21], %54 {strides = array<i32>} : memref<16x32xf32, #tpu.memory_space<vmem>>, vector<8x8xf32>,
    %56 = vector.extract_strided_slice %30 {offsets = [0, 8], sizes = [8, 8], strides = [1, 1]} : vector<8x32xbf16> to vector<8x8xbf16>
    %57 = vector.extract_strided_slice %32 {offsets = [0, 8], sizes = [8, 8], strides = [1, 1]} : vector<8x32xbf16> to vector<8x8xbf16>
    %cst_22 = arith.constant dense<0.000000e+00> : vector<8x8xf32>
    %58 = tpu.matmul %56, %57, %cst_22 {dimension_numbers = #tpu.dot_dimension_numbers<[1], [1], [0], [0], [0, 0, 1, 0], [], []>} : vector<8x8xbf16>, vector<8x8xbf16>, vector<8x8xf32> -> vector<8x8xf32>
    %cst_23 = arith.constant 0.353553385 : f32
    %59 = vector.broadcast %cst_23 : f32 to vector<8x8xf32>
    %60 = arith.mulf %58, %59 : vector<8x8xf32>
    %cst_24 = arith.constant -1.000000e+30 : f32
    %61 = vector.broadcast %cst_24 : f32 to vector<8x8xf32>
    %62 = arith.select %28, %60, %61 : vector<8x8xi1>, vector<8x8xf32>
    %cst_25 = arith.constant dense<0xFF800000> : vector<8xf32>
    %63 = vector.multi_reduction <maximumf>, %62, %cst_25 [1] : vector<8x8xf32> to vector<8xf32>
    %64 = vector.shape_cast %63 : vector<8xf32> to vector<8x1xf32>
    %65 = vector.broadcast %64 : vector<8x1xf32> to vector<8x8xf32>
    %66 = arith.subf %62, %65 : vector<8x8xf32>
    %67 = math.exp %66 : vector<8x8xf32>
    %cst_26 = arith.constant dense<0.000000e+00> : vector<8xf32>
    %68 = vector.multi_reduction <add>, %67, %cst_26 [1] : vector<8x8xf32> to vector<8xf32>
    %69 = vector.shape_cast %68 : vector<8xf32> to vector<8x1xf32>
    %70 = tpu.reciprocal %69 {approx = true} : vector<8x1xf32> -> vector<8x1xf32>
    %71 = vector.broadcast %70 : vector<8x1xf32> to vector<8x8xf32>
    %72 = arith.mulf %67, %71 : vector<8x8xf32>
    %73 = arith.truncf %72 : vector<8x8xf32> to vector<8x8xbf16>
    %74 = vector.extract_strided_slice %34 {offsets = [0, 8], sizes = [8, 8], strides = [1, 1]} : vector<8x32xbf16> to vector<8x8xbf16>
    %cst_27 = arith.constant dense<0.000000e+00> : vector<8x8xf32>
    %75 = tpu.matmul %73, %74, %cst_27 {dimension_numbers = #tpu.dot_dimension_numbers<[1], [0], [0], [1], [0, 0, 1, 1], [], []>} : vector<8x8xbf16>, vector<8x8xbf16>, vector<8x8xf32> -> vector<8x8xf32>
    %c0_28 = arith.constant 0 : index
    %c8 = arith.constant 8 : index
    %76 = vector.load %arg19[%c0_28, %c8] : memref<16x32xf32, #tpu.memory_space<vmem>>, vector<8x8xf32>
    tpu.vector_store %arg19[%c0_28, %c8], %75 {strides = array<i32>} : memref<16x32xf32, #tpu.memory_space<vmem>>, vector<8x8xf32>,
    %77 = vector.extract_strided_slice %30 {offsets = [0, 16], sizes = [8, 8], strides = [1, 1]} : vector<8x32xbf16> to vector<8x8xbf16>
    %78 = vector.extract_strided_slice %32 {offsets = [0, 16], sizes = [8, 8], strides = [1, 1]} : vector<8x32xbf16> to vector<8x8xbf16>
    %cst_29 = arith.constant dense<0.000000e+00> : vector<8x8xf32>
    %79 = tpu.matmul %77, %78, %cst_29 {dimension_numbers = #tpu.dot_dimension_numbers<[1], [1], [0], [0], [0, 0, 1, 0], [], []>} : vector<8x8xbf16>, vector<8x8xbf16>, vector<8x8xf32> -> vector<8x8xf32>
    %cst_30 = arith.constant 0.353553385 : f32
    %80 = vector.broadcast %cst_30 : f32 to vector<8x8xf32>
    %81 = arith.mulf %79, %80 : vector<8x8xf32>
    %cst_31 = arith.constant -1.000000e+30 : f32
    %82 = vector.broadcast %cst_31 : f32 to vector<8x8xf32>
    %83 = arith.select %28, %81, %82 : vector<8x8xi1>, vector<8x8xf32>
    %cst_32 = arith.constant dense<0xFF800000> : vector<8xf32>
    %84 = vector.multi_reduction <maximumf>, %83, %cst_32 [1] : vector<8x8xf32> to vector<8xf32>
    %85 = vector.shape_cast %84 : vector<8xf32> to vector<8x1xf32>
    %86 = vector.broadcast %85 : vector<8x1xf32> to vector<8x8xf32>
    %87 = arith.subf %83, %86 : vector<8x8xf32>
    %88 = math.exp %87 : vector<8x8xf32>
    %cst_33 = arith.constant dense<0.000000e+00> : vector<8xf32>
    %89 = vector.multi_reduction <add>, %88, %cst_33 [1] : vector<8x8xf32> to vector<8xf32>
    %90 = vector.shape_cast %89 : vector<8xf32> to vector<8x1xf32>
    %91 = tpu.reciprocal %90 {approx = true} : vector<8x1xf32> -> vector<8x1xf32>
    %92 = vector.broadcast %91 : vector<8x1xf32> to vector<8x8xf32>
    %93 = arith.mulf %88, %92 : vector<8x8xf32>
    %94 = arith.truncf %93 : vector<8x8xf32> to vector<8x8xbf16>
    %95 = vector.extract_strided_slice %34 {offsets = [0, 16], sizes = [8, 8], strides = [1, 1]} : vector<8x32xbf16> to vector<8x8xbf16>
    %cst_34 = arith.constant dense<0.000000e+00> : vector<8x8xf32>
    %96 = tpu.matmul %94, %95, %cst_34 {dimension_numbers = #tpu.dot_dimension_numbers<[1], [0], [0], [1], [0, 0, 1, 1], [], []>} : vector<8x8xbf16>, vector<8x8xbf16>, vector<8x8xf32> -> vector<8x8xf32>
    %c0_35 = arith.constant 0 : index
    %c16 = arith.constant 16 : index
    %97 = vector.load %arg19[%c0_35, %c16] : memref<16x32xf32, #tpu.memory_space<vmem>>, vector<8x8xf32>
    tpu.vector_store %arg19[%c0_35, %c16], %96 {strides = array<i32>} : memref<16x32xf32, #tpu.memory_space<vmem>>, vector<8x8xf32>,
    %98 = vector.extract_strided_slice %30 {offsets = [0, 24], sizes = [8, 8], strides = [1, 1]} : vector<8x32xbf16> to vector<8x8xbf16>
    %99 = vector.extract_strided_slice %32 {offsets = [0, 24], sizes = [8, 8], strides = [1, 1]} : vector<8x32xbf16> to vector<8x8xbf16>
    %cst_36 = arith.constant dense<0.000000e+00> : vector<8x8xf32>
    %100 = tpu.matmul %98, %99, %cst_36 {dimension_numbers = #tpu.dot_dimension_numbers<[1], [1], [0], [0], [0, 0, 1, 0], [], []>} : vector<8x8xbf16>, vector<8x8xbf16>, vector<8x8xf32> -> vector<8x8xf32>
    %cst_37 = arith.constant 0.353553385 : f32
    %101 = vector.broadcast %cst_37 : f32 to vector<8x8xf32>
    %102 = arith.mulf %100, %101 : vector<8x8xf32>
    %cst_38 = arith.constant -1.000000e+30 : f32
    %103 = vector.broadcast %cst_38 : f32 to vector<8x8xf32>
    %104 = arith.select %28, %102, %103 : vector<8x8xi1>, vector<8x8xf32>
    %cst_39 = arith.constant dense<0xFF800000> : vector<8xf32>
    %105 = vector.multi_reduction <maximumf>, %104, %cst_39 [1] : vector<8x8xf32> to vector<8xf32>
    %106 = vector.shape_cast %105 : vector<8xf32> to vector<8x1xf32>
    %107 = vector.broadcast %106 : vector<8x1xf32> to vector<8x8xf32>
    %108 = arith.subf %104, %107 : vector<8x8xf32>
    %109 = math.exp %108 : vector<8x8xf32>
    %cst_40 = arith.constant dense<0.000000e+00> : vector<8xf32>
    %110 = vector.multi_reduction <add>, %109, %cst_40 [1] : vector<8x8xf32> to vector<8xf32>
    %111 = vector.shape_cast %110 : vector<8xf32> to vector<8x1xf32>
    %112 = tpu.reciprocal %111 {approx = true} : vector<8x1xf32> -> vector<8x1xf32>
    %113 = vector.broadcast %112 : vector<8x1xf32> to vector<8x8xf32>
    %114 = arith.mulf %109, %113 : vector<8x8xf32>
    %115 = arith.truncf %114 : vector<8x8xf32> to vector<8x8xbf16>
    %116 = vector.extract_strided_slice %34 {offsets = [0, 24], sizes = [8, 8], strides = [1, 1]} : vector<8x32xbf16> to vector<8x8xbf16>
    %cst_41 = arith.constant dense<0.000000e+00> : vector<8x8xf32>
    %117 = tpu.matmul %115, %116, %cst_41 {dimension_numbers = #tpu.dot_dimension_numbers<[1], [0], [0], [1], [0, 0, 1, 1], [], []>} : vector<8x8xbf16>, vector<8x8xbf16>, vector<8x8xf32> -> vector<8x8xf32>
    %c0_42 = arith.constant 0 : index
    %c24 = arith.constant 24 : index
    %118 = vector.load %arg19[%c0_42, %c24] : memref<16x32xf32, #tpu.memory_space<vmem>>, vector<8x8xf32>
    tpu.vector_store %arg19[%c0_42, %c24], %117 {strides = array<i32>} : memref<16x32xf32, #tpu.memory_space<vmem>>, vector<8x8xf32>,
    %119 = vector.extract_strided_slice %25 {offsets = [8, 0], sizes = [8, 32], strides = [1, 1]} : vector<16x96xf32> to vector<8x32xf32>
    %120 = arith.truncf %119 : vector<8x32xf32> to vector<8x32xbf16>
    %121 = vector.extract_strided_slice %25 {offsets = [8, 32], sizes = [8, 32], strides = [1, 1]} : vector<16x96xf32> to vector<8x32xf32>
    %122 = arith.truncf %121 : vector<8x32xf32> to vector<8x32xbf16>
    %123 = vector.extract_strided_slice %25 {offsets = [8, 64], sizes = [8, 32], strides = [1, 1]} : vector<16x96xf32> to vector<8x32xf32>
    %124 = arith.truncf %123 : vector<8x32xf32> to vector<8x32xbf16>
    %125 = vector.extract_strided_slice %120 {offsets = [0, 0], sizes = [8, 8], strides = [1, 1]} : vector<8x32xbf16> to vector<8x8xbf16>
    %126 = vector.extract_strided_slice %122 {offsets = [0, 0], sizes = [8, 8], strides = [1, 1]} : vector<8x32xbf16> to vector<8x8xbf16>
    %cst_43 = arith.constant dense<0.000000e+00> : vector<8x8xf32>
    %127 = tpu.matmul %125, %126, %cst_43 {dimension_numbers = #tpu.dot_dimension_numbers<[1], [1], [0], [0], [0, 0, 1, 0], [], []>} : vector<8x8xbf16>, vector<8x8xbf16>, vector<8x8xf32> -> vector<8x8xf32>
    %cst_44 = arith.constant 0.353553385 : f32
    %128 = vector.broadcast %cst_44 : f32 to vector<8x8xf32>
    %129 = arith.mulf %127, %128 : vector<8x8xf32>
    %cst_45 = arith.constant -1.000000e+30 : f32
    %130 = vector.broadcast %cst_45 : f32 to vector<8x8xf32>
    %131 = arith.select %28, %129, %130 : vector<8x8xi1>, vector<8x8xf32>
    %cst_46 = arith.constant dense<0xFF800000> : vector<8xf32>
    %132 = vector.multi_reduction <maximumf>, %131, %cst_46 [1] : vector<8x8xf32> to vector<8xf32>
    %133 = vector.shape_cast %132 : vector<8xf32> to vector<8x1xf32>
    %134 = vector.broadcast %133 : vector<8x1xf32> to vector<8x8xf32>
    %135 = arith.subf %131, %134 : vector<8x8xf32>
    %136 = math.exp %135 : vector<8x8xf32>
    %cst_47 = arith.constant dense<0.000000e+00> : vector<8xf32>
    %137 = vector.multi_reduction <add>, %136, %cst_47 [1] : vector<8x8xf32> to vector<8xf32>
    %138 = vector.shape_cast %137 : vector<8xf32> to vector<8x1xf32>
    %139 = tpu.reciprocal %138 {approx = true} : vector<8x1xf32> -> vector<8x1xf32>
    %140 = vector.broadcast %139 : vector<8x1xf32> to vector<8x8xf32>
    %141 = arith.mulf %136, %140 : vector<8x8xf32>
    %142 = arith.truncf %141 : vector<8x8xf32> to vector<8x8xbf16>
    %143 = vector.extract_strided_slice %124 {offsets = [0, 0], sizes = [8, 8], strides = [1, 1]} : vector<8x32xbf16> to vector<8x8xbf16>
    %cst_48 = arith.constant dense<0.000000e+00> : vector<8x8xf32>
    %144 = tpu.matmul %142, %143, %cst_48 {dimension_numbers = #tpu.dot_dimension_numbers<[1], [0], [0], [1], [0, 0, 1, 1], [], []>} : vector<8x8xbf16>, vector<8x8xbf16>, vector<8x8xf32> -> vector<8x8xf32>
    %c8_49 = arith.constant 8 : index
    %c0_50 = arith.constant 0 : index
    %145 = vector.load %arg19[%c8_49, %c0_50] : memref<16x32xf32, #tpu.memory_space<vmem>>, vector<8x8xf32>
    tpu.vector_store %arg19[%c8_49, %c0_50], %144 {strides = array<i32>} : memref<16x32xf32, #tpu.memory_space<vmem>>, vector<8x8xf32>,
    %146 = vector.extract_strided_slice %120 {offsets = [0, 8], sizes = [8, 8], strides = [1, 1]} : vector<8x32xbf16> to vector<8x8xbf16>
    %147 = vector.extract_strided_slice %122 {offsets = [0, 8], sizes = [8, 8], strides = [1, 1]} : vector<8x32xbf16> to vector<8x8xbf16>
    %cst_51 = arith.constant dense<0.000000e+00> : vector<8x8xf32>
    %148 = tpu.matmul %146, %147, %cst_51 {dimension_numbers = #tpu.dot_dimension_numbers<[1], [1], [0], [0], [0, 0, 1, 0], [], []>} : vector<8x8xbf16>, vector<8x8xbf16>, vector<8x8xf32> -> vector<8x8xf32>
    %cst_52 = arith.constant 0.353553385 : f32
    %149 = vector.broadcast %cst_52 : f32 to vector<8x8xf32>
    %150 = arith.mulf %148, %149 : vector<8x8xf32>
    %cst_53 = arith.constant -1.000000e+30 : f32
    %151 = vector.broadcast %cst_53 : f32 to vector<8x8xf32>
    %152 = arith.select %28, %150, %151 : vector<8x8xi1>, vector<8x8xf32>
    %cst_54 = arith.constant dense<0xFF800000> : vector<8xf32>
    %153 = vector.multi_reduction <maximumf>, %152, %cst_54 [1] : vector<8x8xf32> to vector<8xf32>
    %154 = vector.shape_cast %153 : vector<8xf32> to vector<8x1xf32>
    %155 = vector.broadcast %154 : vector<8x1xf32> to vector<8x8xf32>
    %156 = arith.subf %152, %155 : vector<8x8xf32>
    %157 = math.exp %156 : vector<8x8xf32>
    %cst_55 = arith.constant dense<0.000000e+00> : vector<8xf32>
    %158 = vector.multi_reduction <add>, %157, %cst_55 [1] : vector<8x8xf32> to vector<8xf32>
    %159 = vector.shape_cast %158 : vector<8xf32> to vector<8x1xf32>
    %160 = tpu.reciprocal %159 {approx = true} : vector<8x1xf32> -> vector<8x1xf32>
    %161 = vector.broadcast %160 : vector<8x1xf32> to vector<8x8xf32>
    %162 = arith.mulf %157, %161 : vector<8x8xf32>
    %163 = arith.truncf %162 : vector<8x8xf32> to vector<8x8xbf16>
    %164 = vector.extract_strided_slice %124 {offsets = [0, 8], sizes = [8, 8], strides = [1, 1]} : vector<8x32xbf16> to vector<8x8xbf16>
    %cst_56 = arith.constant dense<0.000000e+00> : vector<8x8xf32>
    %165 = tpu.matmul %163, %164, %cst_56 {dimension_numbers = #tpu.dot_dimension_numbers<[1], [0], [0], [1], [0, 0, 1, 1], [], []>} : vector<8x8xbf16>, vector<8x8xbf16>, vector<8x8xf32> -> vector<8x8xf32>
    %c8_57 = arith.constant 8 : index
    %c8_58 = arith.constant 8 : index
    %166 = vector.load %arg19[%c8_57, %c8_58] : memref<16x32xf32, #tpu.memory_space<vmem>>, vector<8x8xf32>
    tpu.vector_store %arg19[%c8_57, %c8_58], %165 {strides = array<i32>} : memref<16x32xf32, #tpu.memory_space<vmem>>, vector<8x8xf32>,
    %167 = vector.extract_strided_slice %120 {offsets = [0, 16], sizes = [8, 8], strides = [1, 1]} : vector<8x32xbf16> to vector<8x8xbf16>
    %168 = vector.extract_strided_slice %122 {offsets = [0, 16], sizes = [8, 8], strides = [1, 1]} : vector<8x32xbf16> to vector<8x8xbf16>
    %cst_59 = arith.constant dense<0.000000e+00> : vector<8x8xf32>
    %169 = tpu.matmul %167, %168, %cst_59 {dimension_numbers = #tpu.dot_dimension_numbers<[1], [1], [0], [0], [0, 0, 1, 0], [], []>} : vector<8x8xbf16>, vector<8x8xbf16>, vector<8x8xf32> -> vector<8x8xf32>
    %cst_60 = arith.constant 0.353553385 : f32
    %170 = vector.broadcast %cst_60 : f32 to vector<8x8xf32>
    %171 = arith.mulf %169, %170 : vector<8x8xf32>
    %cst_61 = arith.constant -1.000000e+30 : f32
    %172 = vector.broadcast %cst_61 : f32 to vector<8x8xf32>
    %173 = arith.select %28, %171, %172 : vector<8x8xi1>, vector<8x8xf32>
    %cst_62 = arith.constant dense<0xFF800000> : vector<8xf32>
    %174 = vector.multi_reduction <maximumf>, %173, %cst_62 [1] : vector<8x8xf32> to vector<8xf32>
    %175 = vector.shape_cast %174 : vector<8xf32> to vector<8x1xf32>
    %176 = vector.broadcast %175 : vector<8x1xf32> to vector<8x8xf32>
    %177 = arith.subf %173, %176 : vector<8x8xf32>
    %178 = math.exp %177 : vector<8x8xf32>
    %cst_63 = arith.constant dense<0.000000e+00> : vector<8xf32>
    %179 = vector.multi_reduction <add>, %178, %cst_63 [1] : vector<8x8xf32> to vector<8xf32>
    %180 = vector.shape_cast %179 : vector<8xf32> to vector<8x1xf32>
    %181 = tpu.reciprocal %180 {approx = true} : vector<8x1xf32> -> vector<8x1xf32>
    %182 = vector.broadcast %181 : vector<8x1xf32> to vector<8x8xf32>
    %183 = arith.mulf %178, %182 : vector<8x8xf32>
    %184 = arith.truncf %183 : vector<8x8xf32> to vector<8x8xbf16>
    %185 = vector.extract_strided_slice %124 {offsets = [0, 16], sizes = [8, 8], strides = [1, 1]} : vector<8x32xbf16> to vector<8x8xbf16>
    %cst_64 = arith.constant dense<0.000000e+00> : vector<8x8xf32>
    %186 = tpu.matmul %184, %185, %cst_64 {dimension_numbers = #tpu.dot_dimension_numbers<[1], [0], [0], [1], [0, 0, 1, 1], [], []>} : vector<8x8xbf16>, vector<8x8xbf16>, vector<8x8xf32> -> vector<8x8xf32>
    %c8_65 = arith.constant 8 : index
    %c16_66 = arith.constant 16 : index
    %187 = vector.load %arg19[%c8_65, %c16_66] : memref<16x32xf32, #tpu.memory_space<vmem>>, vector<8x8xf32>
    tpu.vector_store %arg19[%c8_65, %c16_66], %186 {strides = array<i32>} : memref<16x32xf32, #tpu.memory_space<vmem>>, vector<8x8xf32>,
    %188 = vector.extract_strided_slice %120 {offsets = [0, 24], sizes = [8, 8], strides = [1, 1]} : vector<8x32xbf16> to vector<8x8xbf16>
    %189 = vector.extract_strided_slice %122 {offsets = [0, 24], sizes = [8, 8], strides = [1, 1]} : vector<8x32xbf16> to vector<8x8xbf16>
    %cst_67 = arith.constant dense<0.000000e+00> : vector<8x8xf32>
    %190 = tpu.matmul %188, %189, %cst_67 {dimension_numbers = #tpu.dot_dimension_numbers<[1], [1], [0], [0], [0, 0, 1, 0], [], []>} : vector<8x8xbf16>, vector<8x8xbf16>, vector<8x8xf32> -> vector<8x8xf32>
    %cst_68 = arith.constant 0.353553385 : f32
    %191 = vector.broadcast %cst_68 : f32 to vector<8x8xf32>
    %192 = arith.mulf %190, %191 : vector<8x8xf32>
    %cst_69 = arith.constant -1.000000e+30 : f32
    %193 = vector.broadcast %cst_69 : f32 to vector<8x8xf32>
    %194 = arith.select %28, %192, %193 : vector<8x8xi1>, vector<8x8xf32>
    %cst_70 = arith.constant dense<0xFF800000> : vector<8xf32>
    %195 = vector.multi_reduction <maximumf>, %194, %cst_70 [1] : vector<8x8xf32> to vector<8xf32>
    %196 = vector.shape_cast %195 : vector<8xf32> to vector<8x1xf32>
    %197 = vector.broadcast %196 : vector<8x1xf32> to vector<8x8xf32>
    %198 = arith.subf %194, %197 : vector<8x8xf32>
    %199 = math.exp %198 : vector<8x8xf32>
    %cst_71 = arith.constant dense<0.000000e+00> : vector<8xf32>
    %200 = vector.multi_reduction <add>, %199, %cst_71 [1] : vector<8x8xf32> to vector<8xf32>
    %201 = vector.shape_cast %200 : vector<8xf32> to vector<8x1xf32>
    %202 = tpu.reciprocal %201 {approx = true} : vector<8x1xf32> -> vector<8x1xf32>
    %203 = vector.broadcast %202 : vector<8x1xf32> to vector<8x8xf32>
    %204 = arith.mulf %199, %203 : vector<8x8xf32>
    %205 = arith.truncf %204 : vector<8x8xf32> to vector<8x8xbf16>
    %206 = vector.extract_strided_slice %124 {offsets = [0, 24], sizes = [8, 8], strides = [1, 1]} : vector<8x32xbf16> to vector<8x8xbf16>
    %cst_72 = arith.constant dense<0.000000e+00> : vector<8x8xf32>
    %207 = tpu.matmul %205, %206, %cst_72 {dimension_numbers = #tpu.dot_dimension_numbers<[1], [0], [0], [1], [0, 0, 1, 1], [], []>} : vector<8x8xbf16>, vector<8x8xbf16>, vector<8x8xf32> -> vector<8x8xf32>
    %c8_73 = arith.constant 8 : index
    %c24_74 = arith.constant 24 : index
    %208 = vector.load %arg19[%c8_73, %c24_74] : memref<16x32xf32, #tpu.memory_space<vmem>>, vector<8x8xf32>
    tpu.vector_store %arg19[%c8_73, %c24_74], %207 {strides = array<i32>} : memref<16x32xf32, #tpu.memory_space<vmem>>, vector<8x8xf32>,
    %c0_75 = arith.constant 0 : index
    %c0_76 = arith.constant 0 : index
    %209 = vector.load %arg19[%c0_75, %c0_76] : memref<16x32xf32, #tpu.memory_space<vmem>>, vector<16x32xf32>
    %210 = arith.truncf %209 : vector<16x32xf32> to vector<16x32xbf16>
    %c0_77 = arith.constant 0 : index
    %c0_78 = arith.constant 0 : index
    %c0_79 = arith.constant 0 : index
    %211 = vector.load %arg7[%c0_77, %c0_78, %c0_79] : memref<1x32x32xbf16, #tpu.memory_space<vmem>>, vector<1x32x32xbf16>
    %212 = vector.shape_cast %211 : vector<1x32x32xbf16> to vector<32x32xbf16>
    %cst_80 = arith.constant dense<0.000000e+00> : vector<16x32xf32>
    %213 = tpu.matmul %210, %212, %cst_80 {dimension_numbers = #tpu.dot_dimension_numbers<[1], [0], [0], [1], [0, 0, 1, 1], [], []>} : vector<16x32xbf16>, vector<32x32xbf16>, vector<16x32xf32> -> vector<16x32xf32>
    %214 = arith.addf %3, %213 : vector<16x32xf32>
    %c0_81 = arith.constant 0 : index
    %c0_82 = arith.constant 0 : index
    %c0_83 = arith.constant 0 : index
    %215 = vector.load %arg8[%c0_81, %c0_82, %c0_83] : memref<1x1x32xf32, #tpu.memory_space<vmem>>, vector<1x1x32xf32>
    %216 = vector.shape_cast %215 : vector<1x1x32xf32> to vector<1x32xf32>
    %217 = vector.broadcast %216 : vector<1x32xf32> to vector<16x32xf32>
    %218 = arith.addf %214, %217 : vector<16x32xf32>
    %c0_84 = arith.constant 0 : index
    %c0_85 = arith.constant 0 : index
    %c0_86 = arith.constant 0 : index
    %219 = vector.load %arg9[%c0_84, %c0_85, %c0_86] : memref<1x1x32xf32, #tpu.memory_space<vmem>>, vector<1x1x32xf32>
    %220 = vector.shape_cast %219 : vector<1x1x32xf32> to vector<1x32xf32>
    %221 = arith.mulf %218, %218 : vector<16x32xf32>
    %cst_87 = arith.constant dense<0.000000e+00> : vector<16xf32>
    %222 = vector.multi_reduction <add>, %221, %cst_87 [1] : vector<16x32xf32> to vector<16xf32>
    %223 = vector.shape_cast %222 : vector<16xf32> to vector<16x1xf32>
    %cst_88 = arith.constant 3.200000e+01 : f32
    %224 = vector.broadcast %cst_88 : f32 to vector<16x1xf32>
    %225 = arith.divf %223, %224 : vector<16x1xf32>
    %cst_89 = arith.constant 9.99999997E-7 : f32
    %226 = vector.broadcast %cst_89 : f32 to vector<16x1xf32>
    %227 = arith.addf %225, %226 : vector<16x1xf32>
    %228 = math.rsqrt %227 : vector<16x1xf32>
    %229 = vector.broadcast %228 : vector<16x1xf32> to vector<16x32xf32>
    %230 = arith.mulf %218, %229 : vector<16x32xf32>
    %231 = vector.broadcast %220 : vector<1x32xf32> to vector<16x32xf32>
    %232 = arith.mulf %230, %231 : vector<16x32xf32>
    %233 = arith.truncf %232 : vector<16x32xf32> to vector<16x32xbf16>
    %c0_90 = arith.constant 0 : index
    %c0_91 = arith.constant 0 : index
    %c0_92 = arith.constant 0 : index
    %234 = vector.load %arg10[%c0_90, %c0_91, %c0_92] : memref<1x32x128xbf16, #tpu.memory_space<vmem>>, vector<1x32x128xbf16>
    %235 = vector.shape_cast %234 : vector<1x32x128xbf16> to vector<32x128xbf16>
    %cst_93 = arith.constant dense<0.000000e+00> : vector<16x128xf32>
    %236 = tpu.matmul %233, %235, %cst_93 {dimension_numbers = #tpu.dot_dimension_numbers<[1], [0], [0], [1], [0, 0, 1, 1], [], []>} : vector<16x32xbf16>, vector<32x128xbf16>, vector<16x128xf32> -> vector<16x128xf32>
    %c0_94 = arith.constant 0 : index
    %c0_95 = arith.constant 0 : index
    %c0_96 = arith.constant 0 : index
    %237 = vector.load %arg11[%c0_94, %c0_95, %c0_96] : memref<1x1x128xf32, #tpu.memory_space<vmem>>, vector<1x1x128xf32>
    %238 = vector.shape_cast %237 : vector<1x1x128xf32> to vector<1x128xf32>
    %239 = vector.broadcast %238 : vector<1x128xf32> to vector<16x128xf32>
    %240 = arith.addf %236, %239 : vector<16x128xf32>
    %cst_97 = arith.constant 5.000000e-01 : f32
    %241 = vector.broadcast %cst_97 : f32 to vector<16x128xf32>
    %242 = arith.mulf %241, %240 : vector<16x128xf32>
    %cst_98 = arith.constant 0.707106769 : f32
    %243 = vector.broadcast %cst_98 : f32 to vector<16x128xf32>
    %244 = arith.mulf %240, %243 : vector<16x128xf32>
    %245 = math.erf %244 : vector<16x128xf32>
    %cst_99 = arith.constant 1.000000e+00 : f32
    %246 = vector.broadcast %cst_99 : f32 to vector<16x128xf32>
    %247 = arith.addf %246, %245 : vector<16x128xf32>
    %248 = arith.mulf %242, %247 : vector<16x128xf32>
    %249 = arith.truncf %248 : vector<16x128xf32> to vector<16x128xbf16>
    %c0_100 = arith.constant 0 : index
    %c0_101 = arith.constant 0 : index
    %c0_102 = arith.constant 0 : index
    %250 = vector.load %arg12[%c0_100, %c0_101, %c0_102] : memref<1x128x32xbf16, #tpu.memory_space<vmem>>, vector<1x128x32xbf16>
    %251 = vector.shape_cast %250 : vector<1x128x32xbf16> to vector<128x32xbf16>
    %cst_103 = arith.constant dense<0.000000e+00> : vector<16x32xf32>
    %252 = tpu.matmul %249, %251, %cst_103 {dimension_numbers = #tpu.dot_dimension_numbers<[1], [0], [0], [1], [0, 0, 1, 1], [], []>} : vector<16x128xbf16>, vector<128x32xbf16>, vector<16x32xf32> -> vector<16x32xf32>
    %c0_104 = arith.constant 0 : index
    %c0_105 = arith.constant 0 : index
    %c0_106 = arith.constant 0 : index
    %253 = vector.load %arg13[%c0_104, %c0_105, %c0_106] : memref<1x1x32xf32, #tpu.memory_space<vmem>>, vector<1x1x32xf32>
    %254 = vector.shape_cast %253 : vector<1x1x32xf32> to vector<1x32xf32>
    %255 = vector.broadcast %254 : vector<1x32xf32> to vector<16x32xf32>
    %256 = arith.addf %252, %255 : vector<16x32xf32>
    %257 = arith.addf %218, %256 : vector<16x32xf32>
    %c0_107 = arith.constant 0 : index
    %c0_108 = arith.constant 0 : index
    %258 = vector.load %arg18[%c0_107, %c0_108] : memref<16x32xf32, #tpu.memory_space<vmem>>, vector<16x32xf32>
    tpu.vector_store %arg18[%c0_107, %c0_108], %257 {strides = array<i32>} : memref<16x32xf32, #tpu.memory_space<vmem>>, vector<16x32xf32>,
    %c1_i32 = arith.constant 1 : i32
    %259 = arith.cmpi eq, %arg1, %c1_i32 : i32
    %260 = arith.extui %259 : i1 to i32
    %c0_i32_109 = arith.constant 0 : i32
    %261 = arith.cmpi ne, %260, %c0_i32_109 : i32
    scf.if %261 {
      %c0_110 = arith.constant 0 : index
      %c0_111 = arith.constant 0 : index
      %262 = vector.load %arg14[%c0_110, %c0_111] : memref<1x32xf32, #tpu.memory_space<vmem>>, vector<1x32xf32>
      %263 = arith.mulf %257, %257 : vector<16x32xf32>
      %cst_112 = arith.constant dense<0.000000e+00> : vector<16xf32>
      %264 = vector.multi_reduction <add>, %263, %cst_112 [1] : vector<16x32xf32> to vector<16xf32>
      %265 = vector.shape_cast %264 : vector<16xf32> to vector<16x1xf32>
      %cst_113 = arith.constant 3.200000e+01 : f32
      %266 = vector.broadcast %cst_113 : f32 to vector<16x1xf32>
      %267 = arith.divf %265, %266 : vector<16x1xf32>
      %cst_114 = arith.constant 9.99999997E-7 : f32
      %268 = vector.broadcast %cst_114 : f32 to vector<16x1xf32>
      %269 = arith.addf %267, %268 : vector<16x1xf32>
      %270 = math.rsqrt %269 : vector<16x1xf32>
      %271 = vector.broadcast %270 : vector<16x1xf32> to vector<16x32xf32>
      %272 = arith.mulf %257, %271 : vector<16x32xf32>
      %273 = vector.broadcast %262 : vector<1x32xf32> to vector<16x32xf32>
      %274 = arith.mulf %272, %273 : vector<16x32xf32>
      %275 = arith.truncf %274 : vector<16x32xf32> to vector<16x32xbf16>
      %c0_115 = arith.constant 0 : index
      %c0_116 = arith.constant 0 : index
      %276 = vector.load %arg15[%c0_115, %c0_116] : memref<32x128xbf16, #tpu.memory_space<vmem>>, vector<32x128xbf16>
      %cst_117 = arith.constant dense<0.000000e+00> : vector<16x128xf32>
      %277 = tpu.matmul %275, %276, %cst_117 {dimension_numbers = #tpu.dot_dimension_numbers<[1], [0], [0], [1], [0, 0, 1, 1], [], []>} : vector<16x32xbf16>, vector<32x128xbf16>, vector<16x128xf32> -> vector<16x128xf32>
      %c0_118 = arith.constant 0 : index
      %c0_119 = arith.constant 0 : index
      %278 = vector.load %arg16[%c0_118, %c0_119] : memref<1x128xf32, #tpu.memory_space<vmem>>, vector<1x128xf32>
      %279 = vector.broadcast %278 : vector<1x128xf32> to vector<16x128xf32>
      %280 = arith.addf %277, %279 : vector<16x128xf32>
      %281 = vector.shape_cast %280 : vector<16x128xf32> to vector<2x8x128xf32>
      %c0_120 = arith.constant 0 : index
      %c0_121 = arith.constant 0 : index
      %c0_122 = arith.constant 0 : index
      %282 = vector.load %arg17[%c0_120, %c0_121, %c0_122] : memref<2x8x128xf32, #tpu.memory_space<vmem>>, vector<2x8x128xf32>
      tpu.vector_store %arg17[%c0_120, %c0_121, %c0_122], %281 {strides = array<i32>} : memref<2x8x128xf32, #tpu.memory_space<vmem>>, vector<2x8x128xf32>,
    } else {
    }
    return
  }
  func.func @transform_0(%arg0: i32, %arg1: i32) -> (i32, i32, i32) {
    %c0_i32 = arith.constant 0 : i32
    %c0_i32_0 = arith.constant 0 : i32
    %c0_i32_1 = arith.constant 0 : i32
    return %arg0, %c0_i32, %c0_i32_0 : i32, i32, i32
  }
  func.func @transform_1(%arg0: i32, %arg1: i32) -> (i32, i32, i32) {
    %c0_i32 = arith.constant 0 : i32
    %c0_i32_0 = arith.constant 0 : i32
    %c0_i32_1 = arith.constant 0 : i32
    %c0_i32_2 = arith.constant 0 : i32
    return %c0_i32, %c0_i32_0, %c0_i32_1 : i32, i32, i32
  }
  func.func @transform_2(%arg0: i32, %arg1: i32) -> (i32, i32, i32) {
    %c0_i32 = arith.constant 0 : i32
    %c0_i32_0 = arith.constant 0 : i32
    %c0_i32_1 = arith.constant 0 : i32
    return %arg1, %c0_i32, %c0_i32_0 : i32, i32, i32
  }
  func.func @transform_3(%arg0: i32, %arg1: i32) -> (i32, i32, i32) {
    %c0_i32 = arith.constant 0 : i32
    %c0_i32_0 = arith.constant 0 : i32
    %c0_i32_1 = arith.constant 0 : i32
    return %arg1, %c0_i32, %c0_i32_0 : i32, i32, i32
  }
  func.func @transform_4(%arg0: i32, %arg1: i32) -> (i32, i32, i32) {
    %c0_i32 = arith.constant 0 : i32
    %c0_i32_0 = arith.constant 0 : i32
    %c0_i32_1 = arith.constant 0 : i32
    return %arg1, %c0_i32, %c0_i32_0 : i32, i32, i32
  }
  func.func @transform_5(%arg0: i32, %arg1: i32) -> (i32, i32, i32) {
    %c0_i32 = arith.constant 0 : i32
    %c0_i32_0 = arith.constant 0 : i32
    %c0_i32_1 = arith.constant 0 : i32
    return %arg1, %c0_i32, %c0_i32_0 : i32, i32, i32
  }
  func.func @transform_6(%arg0: i32, %arg1: i32) -> (i32, i32, i32) {
    %c0_i32 = arith.constant 0 : i32
    %c0_i32_0 = arith.constant 0 : i32
    %c0_i32_1 = arith.constant 0 : i32
    return %arg1, %c0_i32, %c0_i32_0 : i32, i32, i32
  }
  func.func @transform_7(%arg0: i32, %arg1: i32) -> (i32, i32, i32) {
    %c0_i32 = arith.constant 0 : i32
    %c0_i32_0 = arith.constant 0 : i32
    %c0_i32_1 = arith.constant 0 : i32
    return %arg1, %c0_i32, %c0_i32_0 : i32, i32, i32
  }
  func.func @transform_8(%arg0: i32, %arg1: i32) -> (i32, i32, i32) {
    %c0_i32 = arith.constant 0 : i32
    %c0_i32_0 = arith.constant 0 : i32
    %c0_i32_1 = arith.constant 0 : i32
    return %arg1, %c0_i32, %c0_i32_0 : i32, i32, i32
  }
  func.func @transform_9(%arg0: i32, %arg1: i32) -> (i32, i32, i32) {
    %c0_i32 = arith.constant 0 : i32
    %c0_i32_0 = arith.constant 0 : i32
    %c0_i32_1 = arith.constant 0 : i32
    return %arg1, %c0_i32, %c0_i32_0 : i32, i32, i32
  }
  func.func @transform_10(%arg0: i32, %arg1: i32) -> (i32, i32, i32) {
    %c0_i32 = arith.constant 0 : i32
    %c0_i32_0 = arith.constant 0 : i32
    %c0_i32_1 = arith.constant 0 : i32
    return %arg1, %c0_i32, %c0_i32_0 : i32, i32, i32
  }
  func.func @transform_11(%arg0: i32, %arg1: i32) -> (i32, i32, i32) {
    %c0_i32 = arith.constant 0 : i32
    %c0_i32_0 = arith.constant 0 : i32
    %c0_i32_1 = arith.constant 0 : i32
    return %arg1, %c0_i32, %c0_i32_0 : i32, i32, i32
  }
  func.func @transform_12(%arg0: i32, %arg1: i32) -> (i32, i32) {
    %c0_i32 = arith.constant 0 : i32
    %c0_i32_0 = arith.constant 0 : i32
    %c0_i32_1 = arith.constant 0 : i32
    return %c0_i32, %c0_i32_0 : i32, i32
  }
  func.func @transform_13(%arg0: i32, %arg1: i32) -> (i32, i32) {
    %c0_i32 = arith.constant 0 : i32
    %c0_i32_0 = arith.constant 0 : i32
    %c0_i32_1 = arith.constant 0 : i32
    return %c0_i32, %c0_i32_0 : i32, i32
  }
  func.func @transform_14(%arg0: i32, %arg1: i32) -> (i32, i32) {
    %c0_i32 = arith.constant 0 : i32
    %c0_i32_0 = arith.constant 0 : i32
    %c0_i32_1 = arith.constant 0 : i32
    return %c0_i32, %c0_i32_0 : i32, i32
  }
  func.func @transform_15(%arg0: i32, %arg1: i32) -> (i32, i32, i32) {
    %c0_i32 = arith.constant 0 : i32
    %c0_i32_0 = arith.constant 0 : i32
    %c0_i32_1 = arith.constant 0 : i32
    return %arg0, %c0_i32, %c0_i32_0 : i32, i32, i32
  }
}

</mosaic_0001>

<bundles_post_ra>
// kernel: tpu_custom_call.1
= control target key start
LH: loop header
LB: loop body
LE: loop exit
PB: predicated region body
PF: predicated region fallthrough
CT: control target
= control target key end

     0   :  { %s2566_s0 = inlined_call_operand.vmem [shape: f32[2,8,32], index: 0, kind: input, shape index: {}]   ;;  %s2567_s1 = inlined_call_operand.vmem [shape: f32[1,8,32], index: 1, kind: input, shape index: {}]   ;;  %s2568_s2 = inlined_call_operand.vmem [shape: f32[2,1,32], index: 2, kind: input, shape index: {}]   ;;  %s2569_s3 = inlined_call_operand.vmem [shape: bf16[2,32,96], index: 3, kind: input, shape index: {}]   ;;  %s2570_s4 = inlined_call_operand.vmem [shape: f32[2,1,96], index: 4, kind: input, shape index: {}]   ;;  %s2571_s5 = inlined_call_operand.vmem [shape: bf16[2,32,32], index: 5, kind: input, shape index: {}]   ;;  %s2572_s6 = inlined_call_operand.vmem [shape: f32[2,1,32], index: 6, kind: input, shape index: {}]   ;;  %s2573_s7 = inlined_call_operand.vmem [shape: f32[2,1,32], index: 7, kind: input, shape index: {}]   ;;  %s2574_s8 = inlined_call_operand.vmem [shape: bf16[2,32,128], index: 8, kind: input, shape index: {}]   ;;  %s2575_s9 = inlined_call_operand.vmem [shape: f32[2,1,128], index: 9, kind: input, shape index: {}]   ;;  %s2576_s10 = inlined_call_operand.vmem [shape: bf16[2,128,32], index: 10, kind: input, shape index: {}]   ;;  %s2577_s11 = inlined_call_operand.vmem [shape: f32[2,1,32], index: 11, kind: input, shape index: {}]   ;;  %s2578_s12 = inlined_call_operand.vmem [shape: f32[1,32], index: 12, kind: input, shape index: {}]   ;;  %s2579_s13 = inlined_call_operand.vmem [shape: bf16[32,128], index: 13, kind: input, shape index: {}]   ;;  %s2580_s14 = inlined_call_operand.vmem [shape: f32[1,128], index: 14, kind: input, shape index: {}]   ;;  %s2581_s15 = inlined_call_operand.hbm [shape: f32[2,8,128], index: 15, kind: output, shape index: {}]  }
   0x1   :  { %2585 = sst [smem:[#allocation10_spill]] %s2569_s3 }
   0x2   :  { %2586 = sst [smem:[#allocation11_spill]] %s2571_s5 }
   0x3   :  { %2587 = sst [smem:[#allocation12_spill]] %s2578_s12 }
   0x4   :  { %2588 = sst [smem:[#allocation13_spill]] %s2579_s13 }
   0x5   :  { %2589 = sst [smem:[#allocation14_spill]] %s2580_s14 }
   0x6   :  { %2590 = sst [smem:[#allocation15_spill]] %s2581_s15 }
   0x7   :  { %20 = vsyncpa [#allocation5], 0  ;;  %s2209_s18 = smov 0   ;;  %s2211_s19 = smov 0  }
   0x8   :  { %s2213_s20 = smov 0  }
   0x9 LB: > { %2591 = sst [smem:[#allocation7_spill]] %s2106_s19  ;;  %s35_s22 = sadd.s32 1, %s2106_s19  ;;  %s2110_s20 = sphi %s2213_s20, %s26_s20   ;;  %s2106_s19 = sphi %s2211_s19, %s2608_s19   ;;  %s2102_s18 = sphi %s2209_s18, %s2607_s18  }
   0xa   : > { %2592 = sst [smem:[#allocation8_spill]] %s2110_s20  ;;  %p36_p0 = scmp.ge.s32.totalorder %s35_s22, 2 }
   0xb   : > { %p1830_p1 = scmp.ge.s32.totalorder %s2110_s20, 1  ;;  %p539_p2 = scmp.lt.s32.totalorder %s2110_s20, 3 }
   0xc   : > { %s2610_s22 = smov (%p36_p0, %s35_s22), 0 }
   0xd   : > { %2593 = sst [smem:[#allocation9_spill]] %s2610_s22  ;;  %p540_p3 = pnand %p1830_p1, %p539_p2 }
   0xe   : > { %p626_p4 = scmp.lt.s32.totalorder (!%p540_p3), %s2102_s18, 1  ;;  %s2594_s3 = sld [smem:[#allocation10_spill]] (!%p540_p3) }
   0xf   : > { %543 = sbr.rel (%p540_p3) target bundleno = 2621 (0xa3d), region = 80  ;;  %s2595_s5 = sld [smem:[#allocation11_spill]] (!%p540_p3) }
  0x10   : > { %p1839_p5 = scmp.ne.s32.totalorder (!%p540_p3), %s2102_s18, 0 }
  0x14   : > { %s2232_s23 = scalar_select %p626_p4, %s2102_s18, 1 }
  0x16   : > { %s1931_s27 = sshll.u32 %s2232_s23, 4  ;;  %s644_s20 = scalar_lea.vmem %s2572_s6, %s2232_s23 }
  0x17   : > { %s2242_s30 = scalar_lea.vmem %s2594_s3, %s1931_s27  ;;  %s2251_s25 = scalar_lea.vmem %s2595_s5, %s1931_s27 }
  0x18   : > { %s647_s12 = scalar_lea.vmem %s2573_s7, %s2232_s23  ;;  %s2264_s3 = scalar_lea.vmem %s2574_s8, %s1931_s27 }
  0x19   : > { %s655_s21 = scalar_lea.vmem %s2575_s9, %s2232_s23  ;;  %s1934_s22 = sshll.u32 %s2232_s23, 6 }
  0x1a   : > { %s2274_s13 = scalar_lea.vmem %s2576_s10, %s1934_s22  ;;  %s663_s14 = scalar_lea.vmem %s2577_s11, %s2232_s23 }
  0x1b   : > { %669 = sbr.rel (%p1839_p5) target bundleno = 38 (0x26), region = 84 }
  0x20   : > { %v670_v0 = vld [vmem:[%s2566_s0] sm:$0xff]  ;;  %vm675_vm0 = vcmask 261120   ;;  %v671_v2 = vld [vmem:[%s2566_s0 + $0x8] sm:$0xff] }
  0x21   : > { %v672_v1 = vld [vmem:[%s2567_s1] sm:$0xff] }
  0x22   : > { %v673_v3 = vadd.f32 %v672_v1, %v670_v0  ;;  %v674_v4 = vadd.f32 %v672_v1, %v671_v2 }
  0x24   : > { %676 = vst.msk [vmem:[#allocation2] sm:$0xff] %vm675_vm0, %v673_v3 }
  0x25   : > { %677 = vst.msk [vmem:[#allocation2 + $0x8] sm:$0xff] %vm675_vm0, %v674_v4 }
  0x26 PF: > { %vm683_vm1 = vcmask 261120   ;;  %v2112_v11 = vmov 32.0   ;;  %v1936_v17 = vld [vmem:[%s2242_s30 + $0x8] sm:$0xff]  ;;  %v1935_v19 = vld [vmem:[%s2242_s30] sm:$0xff]  ;;  %s2596_s22 = scalar_lea.vmem %s2568_s2, %s2232_s23  ;;  %s2597_s19 = scalar_lea.vmem %s2570_s4, %s2232_s23  ;;  %vm816_vm9 = vcmask 1043456   ;;  %vm777_vm10 = vcmask 64512  }
  0x27   : > { %2004 = vrcp.f32 %v2112_v11  ;;  %758 = vmatpush.bf16.msra.mxu0 %v1936_v17  ;;  %v1998_v40 = vld [vmem:[%s2596_s22] ss:$0 sm:$0xff]  ;;  %s2113_s26 = smov 88   ;;  %s2114_s27 = smov 64   ;;  %v766_v3 = vlaneseq  ;;  %vm896_vm12 = vcmask 130112   ;;  %vm960_vm13 = vcmask 195712  }
  0x28   : > { %v1999_v46 = vld [vmem:[%s2597_s19] ss:$0 sm:$0xff]  ;;  %s2115_s28 = smov 96   ;;  %s2116_s29 = smov 72   ;;  %vm1024_vm14 = vcmask 261312  }
  0x29   : > { %s2117_s16 = smov 80   ;;  %s2118_s5 = smov 120   ;;  %v767_v4 = vshrl.u32 %v766_v3, 7 }
  0x2a   : > { %s2119_s30 = smov 112   ;;  %s2120_s17 = smov 104  }
  0x2b   : > { %v2290_v5 = vld [vmem:[#allocation2] sm:$0xff]  ;;  %759 = vmatpush.bf16.msra.mxu0 %v1935_v19  ;;  %s2121_s22 = smov 40   ;;  %s2122_s24 = smov 48  }
  0x2c   : > { %v681_v6 = vmul.f32 %v2290_v5, %v2290_v5  ;;  %v2294_v7 = vld [vmem:[#allocation2 + $0x8] sm:$0xff]  ;;  %s2123_s15 = smov 56   ;;  %s2124_s19 = smov 16  }
  0x2d   : > { %v682_v9 = vmul.f32 %v2294_v7, %v2294_v7  ;;  %v2005_v12 = vpop.eup %2004  ;;  %p1917_p6 = scmp.ne.s32.totalorder %s2102_s18, 1 }
  0x2e   : > { %v684_v8 = vsel %vm683_vm1, %v681_v6, 0.0  ;;  %v691_v13 = vmul.f32 32.0, %v2005_v12  ;;  %vm695_vm2 = vweird.f32 %v2005_v12  ;;  %v769_v6 = vand.u32 127, %v766_v3 }
  0x2f   : > { %685 = vadd.xlane.f32.xlu0 %v684_v8  ;;  %v687_v10 = vsel %vm683_vm1, %v682_v9, 0.0 }
  0x30   : > { %v692_v14 = vsub.f32 1.0, %v691_v13  ;;  %vm2344_vm11 = vcmp.le.s32.totalorder %v769_v6, %v767_v4 }
  0x32   : > { %v693_v15 = vmul.f32 %v2005_v12, %v692_v14 }
  0x34   : > { %v694_v16 = vadd.f32 %v2005_v12, %v693_v15 }
  0x36   : > { %v2301_v18 = vsel %vm695_vm2, %v2005_v12, %v694_v16 }
  0x37   : > { %688 = vadd.xlane.f32.xlu0 %v687_v10 }
  0xa2   : > { %v686_v20 = vpop.xlane.xlu0 %685 }
  0xa3   : > { %v697_v21 = vmul.f32 %v2301_v18, %v686_v20 }
  0xa5   : > { %v699_v22 = vadd.f32 1e-06, %v697_v21 }
  0xa7   : > { %2006 = vrsqrt.f32 %v699_v22  ;;  %vm707_vm4 = vweird.f32 %v699_v22 }
  0xaa   : > { %v689_v23 = vpop.xlane.xlu0 %688 }
  0xab   : > { %v698_v24 = vmul.f32 %v2301_v18, %v689_v23 }
  0xad   : > { %v2007_v25 = vpop.eup %2006  ;;  %v700_v26 = vadd.f32 1e-06, %v698_v24 }
  0xae   : > { %v702_v27 = vmul.f32 %v2007_v25, %v699_v22  ;;  %vm708_vm3 = vweird.f32 %v2007_v25 }
  0xaf   : > { %2008 = vrsqrt.f32 %v700_v26  ;;  %vm709_vm5 = vmor %vm707_vm4, %vm708_vm3  ;;  %vm717_vm7 = vweird.f32 %v700_v26 }
  0xb0   : > { %v703_v28 = vmul.f32 %v2007_v25, %v702_v27 }
  0xb2   : > { %v704_v29 = vmul.f32 0.5, %v703_v28 }
  0xb4   : > { %v705_v30 = vsub.f32 1.5, %v704_v29 }
  0xb5   : > { %v2009_v31 = vpop.eup %2008 }
  0xb6   : > { %v712_v32 = vmul.f32 %v2009_v31, %v700_v26  ;;  %v706_v33 = vmul.f32 %v2007_v25, %v705_v30  ;;  %vm718_vm6 = vweird.f32 %v2009_v31 }
  0xb7   : > { %vm719_vm8 = vmor %vm717_vm7, %vm718_vm6 }
  0xb8   : > { %v713_v34 = vmul.f32 %v2009_v31, %v712_v32  ;;  %v710_v36 = vsel %vm709_vm5, %v2007_v25, %v706_v33 }
  0xb9   : > { %v721_v39 = vmul.f32 %v710_v36, %v2290_v5 }
  0xba   : > { %v714_v35 = vmul.f32 0.5, %v713_v34 }
  0xbb   : > { %v726_v43 = vmul.f32 %v1998_v40, %v721_v39 }
  0xbc   : > { %v715_v37 = vsub.f32 1.5, %v714_v35 }
  0xbe   : > { %v716_v38 = vmul.f32 %v2009_v31, %v715_v37 }
  0xc0   : > { %v720_v41 = vsel %vm719_vm8, %v2009_v31, %v716_v38 }
  0xc1   : > { %v722_v42 = vmul.f32 %v720_v41, %v2294_v7 }
  0xc3   : > { %v727_v44 = vmul.f32 %v1998_v40, %v722_v42 }
  0xc5   : > { %v728_v45 = vpack.c.bf16 %v727_v44, %v726_v43 }
  0xc7   : > { %1848 = vmatmul.msk.bf16.vlgmr.msra.gmra.mxu0 %vm683_vm1, %v728_v45 }
 0x144   : > { %v761_v47 = vpop.f32.mrf.mxu0 }
 0x145   : > { %v762_v48 = vadd.f32 %v1999_v46, %v761_v47 }
 0x147   : > { %v771_v49 = vpack.c.bf16 %v762_v48, %v762_v48 }
 0x149   : > { %v773_v50 = vunpack.c.l.b16 %v771_v49 }
 0x14b   : > { %v2319_v51 = vpack.c.b16 %v773_v50, %v773_v50 }
 0x14c   : > { %v763_v52 = vpop.f32.mrf.mxu0 }
 0x14d   : > { %836 = vrot.lane.b32.xlu0 %v2319_v51, %s2113_s26  ;;  %811 = vrot.lane.b32.xlu2 %v2319_v51, %s2114_s27  ;;  %v764_v53 = vadd.f32 %v1999_v46, %v763_v52 }
 0x14e   : > { %775 = vrot.lane.b32.xlu1 %v2319_v51, %s2115_s28 }
 0x14f   : > { %v2328_v54 = vpack.c.bf16 %v764_v53, %v764_v53 }
 0x151   : > { %v1028_v55 = vunpack.c.l.b16 %v2328_v54 }
 0x153   : > { %v2332_v56 = vpack.c.b16 %v1028_v55, %v1028_v55 }
 0x155   : > { %964 = vrot.lane.b32.xlu0 %v2319_v51, %s2116_s29 }
 0x15d   : > { %900 = vrot.lane.b32.xlu0 %v2319_v51, %s2117_s16 }
 0x165   : > { %1087 = vrot.lane.b32.xlu0 %v2332_v56, %s2118_s5 }
 0x16d   : > { %1215 = vrot.lane.b32.xlu0 %v2332_v56, %s2116_s29 }
 0x175   : > { %1152 = vrot.lane.b32.xlu0 %v2332_v56, %s2117_s16 }
 0x1a7   : > { %v812_v57 = vpop.permute.xlu2 %811 }
 0x1a8   : > { %v818_v58 = vsel %vm816_vm9, %v812_v57, 0 }
 0x1a9   : > { %827 = vmatpush.bf16.msra.mxu2 %v818_v58 }
 0x1bf   : > { %v837_v59 = vpop.permute.xlu0 %836 }
 0x1c0   : > { %v776_v60 = vpop.permute.xlu1 %775  ;;  %v842_v61 = vsel %vm777_vm10, %v837_v59, 0 }
 0x1c1   : > { %v782_v62 = vsel %vm777_vm10, %v776_v60, 0  ;;  %851 = vmatpush.bf16.xpose.msrb.mxu2 %v842_v61 }
 0x1c2   : > { %791 = vmatpush.bf16.xpose.msra.mxu1 %v782_v62 }
 0x1c7   : > { %v965_v63 = vpop.permute.xlu0 %964 }
 0x1c8   : > { %v970_v0 = vsel %vm777_vm10, %v965_v63, 0 }
 0x1c9   : > { %1849 = vmatmul.msk.bf16.vlgmr.msra.gmra.mxu1 %vm777_vm10, %v771_v49  ;;  %979 = vmatpush.bf16.xpose.msra.mxu3 %v970_v0 }
 0x1cf   : > { %v901_v1 = vpop.permute.xlu0 %900 }
 0x1d0   : > { %v906_v2 = vsel %vm777_vm10, %v901_v1, 0 }
 0x1d1   : > { %915 = vmatpush.bf16.xpose.msrb.mxu0 %v906_v2 }
 0x1d7   : > { %v1088_v26 = vpop.permute.xlu0 %1087 }
 0x1df   : > { %v1216_v28 = vpop.permute.xlu0 %1215 }
 0x1e0   : > { %v1221_v34 = vsel %vm777_vm10, %v1216_v28, 0 }
 0x1e7   : > { %v1153_v37 = vpop.permute.xlu0 %1152 }
 0x1e8   : > { %v1158_v40 = vsel %vm777_vm10, %v1153_v37, 0 }
 0x246   : > { %v793_v8 = vpop.f32.mrf.mxu1 }
 0x247   : > { %v797_v10 = vmul.f32 0.35355338, %v793_v8 }
 0x249   : > { %v798_v11 = vsel %vm2344_vm11, %v797_v10, -1e+30 }
 0x24a   : > { %v799_v12 = vsel %vm777_vm10, %v798_v11, -inf }
 0x24b   : > { %800 = vmax.xlane.f32.xlu1 %v799_v12 }
 0x24e   : > { %v795_v13 = vpop.f32.mrf.mxu1 }
 0x264   : > { %898 = vrot.lane.b32.xlu1 %v2319_v51, %s2119_s30 }
 0x2be   : > { %v801_v14 = vpop.xlane.xlu1 %800 }
 0x2bf   : > { %v802_v15 = vsub.f32 %v798_v11, %v801_v14 }
 0x2c1   : > { %v803_v16 = vmul.f32 1.442695, %v802_v15 }
 0x2c3   : > { %2010 = vpow2.f32 %v803_v16 }
 0x2c9   : > { %v2011_v17 = vpop.eup %2010 }
 0x2ca   : > { %v805_v19 = vsel %vm777_vm10, %v2011_v17, 0.0 }
 0x2cb   : > { %806 = vadd.xlane.f32.xlu2 %v805_v19 }
 0x2d6   : > { %v899_v20 = vpop.permute.xlu1 %898 }
 0x2d7   : > { %1853 = vmatmul.msk.bf16.vlgmr.msrb.gmra.mxu0 %vm777_vm10, %v899_v20 }
 0x2e3   : > { %834 = vrot.lane.b32.xlu2 %v2319_v51, %s2118_s5 }
 0x2eb   : > { %962 = vrot.lane.b32.xlu2 %v2319_v51, %s2120_s17 }
 0x2f3   : > { %1089 = vrot.lane.b32.xlu2 %v2332_v56, %s2113_s26  ;;  %s2125_s26 = smov 8  }
 0x2fb   : > { %1030 = vrot.lane.b32.xlu2 %v2332_v56, %s2115_s28 }
 0x303   : > { %1213 = vrot.lane.b32.xlu2 %v2332_v56, %s2120_s17 }
 0x30b   : > { %1150 = vrot.lane.b32.xlu2 %v2332_v56, %s2119_s30 }
 0x33e   : > { %v807_v21 = vpop.xlane.xlu2 %806 }
 0x33f   : > { %2012 = vrcp.f32 %v807_v21 }
 0x345   : > { %v2013_v22 = vpop.eup %2012 }
 0x346   : > { %v835_v23 = vpop.permute.xlu2 %834  ;;  %v809_v24 = vmul.f32 %v2013_v22, %v2011_v17 }
 0x348   : > { %v810_v25 = vpack.c.bf16 %v809_v24, %v809_v24 }
 0x34a   : > { %1850 = vmatmul.msk.bf16.vlgmr.msra.gmra.mxu2 %vm777_vm10, %v810_v25 }
 0x34e   : > { %v963_v27 = vpop.permute.xlu2 %962 }
 0x34f   : > { %1855 = vmatmul.msk.bf16.vlgmr.msra.gmra.mxu3 %vm777_vm10, %v963_v27 }
 0x354   : > { %v917_v29 = vpop.f32.mrf.mxu0 }
 0x355   : > { %v921_v30 = vmul.f32 0.35355338, %v917_v29 }
 0x356   : > { %v1090_v31 = vpop.permute.xlu2 %1089 }
 0x357   : > { %v1095_v32 = vsel %vm777_vm10, %v1090_v31, 0  ;;  %v2368_v33 = vsel %vm2344_vm11, %v921_v30, -1e+30 }
 0x358   : > { %1104 = vmatpush.bf16.xpose.msrb.mxu3 %v1095_v32  ;;  %v923_v35 = vsel %vm777_vm10, %v2368_v33, -inf }
 0x359   : > { %924 = vmax.xlane.f32.xlu2 %v923_v35 }
 0x35a   : > { %1851 = vmatmul.msk.bf16.vlgmr.msrb.gmra.mxu2 %vm777_vm10, %v835_v23 }
 0x35c   : > { %v919_v36 = vpop.f32.mrf.mxu0 }
 0x35e   : > { %v1031_v38 = vpop.permute.xlu2 %1030 }
 0x35f   : > { %v1036_v39 = vsel %vm777_vm10, %v1031_v38, 0  ;;  %1859 = vmatmul.msk.bf16.vlgmr.msrb.gmra.mxu3 %vm777_vm10, %v1088_v26 }
 0x360   : > { %1230 = vmatpush.bf16.xpose.msra.mxu3 %v1221_v34  ;;  %1045 = vmatpush.bf16.xpose.msra.mxu0 %v1036_v39 }
 0x366   : > { %v1214_v41 = vpop.permute.xlu2 %1213 }
 0x367   : > { %1857 = vmatmul.msk.bf16.vlgmr.msra.gmra.mxu0 %vm777_vm10, %v2328_v54 }
 0x368   : > { %1167 = vmatpush.bf16.xpose.msrb.mxu0 %v1158_v40 }
 0x36e   : > { %v1151_v42 = vpop.permute.xlu2 %1150 }
 0x36f   : > { %1863 = vmatmul.msk.bf16.vlgmr.msra.gmra.mxu3 %vm777_vm10, %v1214_v41 }
 0x377   : > { %1861 = vmatmul.msk.bf16.vlgmr.msrb.gmra.mxu0 %vm777_vm10, %v1151_v42 }
 0x3cc   : > { %v925_v13 = vpop.xlane.xlu2 %924 }
 0x3cd   : > { %v829_v43 = vpop.f32.mrf.mxu2  ;;  %v926_v14 = vsub.f32 %v2368_v33, %v925_v13 }
 0x3ce   : > { %833 = vst.msk [vmem:[#allocation3] sm:$0xff] %vm777_vm10, %v829_v43 }
 0x3cf   : > { %v927_v15 = vmul.f32 1.442695, %v926_v14 }
 0x3d1   : > { %2014 = vpow2.f32 %v927_v15 }
 0x3d2   : > { %v981_v44 = vpop.f32.mrf.mxu3 }
 0x3d3   : > { %v985_v45 = vmul.f32 0.35355338, %v981_v44 }
 0x3d5   : > { %v831_v46 = vpop.f32.mrf.mxu2  ;;  %v986_v47 = vsel %vm2344_vm11, %v985_v45, -1e+30 }
 0x3d6   : > { %v987_v48 = vsel %vm777_vm10, %v986_v47, -inf }
 0x3d7   : > { %988 = vmax.xlane.f32.xlu0 %v987_v48  ;;  %v2015_v16 = vpop.eup %2014 }
 0x3d8   : > { %v929_v17 = vsel %vm777_vm10, %v2015_v16, 0.0 }
 0x3da   : > { %v983_v49 = vpop.f32.mrf.mxu3 }
 0x3dd   : > { %v853_v50 = vpop.f32.mrf.mxu2 }
 0x3de   : > { %v857_v24 = vmul.f32 0.35355338, %v853_v50 }
 0x3e0   : > { %v858_v26 = vsel %vm2344_vm11, %v857_v24, -1e+30 }
 0x3e1   : > { %v859_v30 = vsel %vm777_vm10, %v858_v26, -inf }
 0x3e2   : > { %v1106_v52 = vpop.f32.mrf.mxu3 }
 0x3e3   : > { %v1110_v53 = vmul.f32 0.35355338, %v1106_v52 }
 0x3e4   : > { %v1047_v54 = vpop.f32.mrf.mxu0 }
 0x3e5   : > { %v1051_v55 = vmul.f32 0.35355338, %v1047_v54  ;;  %v855_v57 = vpop.f32.mrf.mxu2  ;;  %v1111_v58 = vsel %vm2344_vm11, %v1110_v53, -1e+30 }
 0x3e6   : > { %v1112_v59 = vsel %vm777_vm10, %v1111_v58, -inf }
 0x3e7   : > { %1113 = vmax.xlane.f32.xlu1 %v1112_v59  ;;  %v1052_v60 = vsel %vm2344_vm11, %v1051_v55, -1e+30 }
 0x3e8   : > { %v1053_v61 = vsel %vm777_vm10, %v1052_v60, -inf }
 0x3e9   : > { %1054 = vmax.xlane.f32.xlu0 %v1053_v61 }
 0x3ea   : > { %v1108_v62 = vpop.f32.mrf.mxu3 }
 0x3ec   : > { %v1049_v63 = vpop.f32.mrf.mxu0 }
 0x3f2   : > { %v1232_v0 = vpop.f32.mrf.mxu3 }
 0x3f3   : > { %v1236_v1 = vmul.f32 0.35355338, %v1232_v0 }
 0x3f4   : > { %v1169_v2 = vpop.f32.mrf.mxu0 }
 0x3f5   : > { %v1173_v3 = vmul.f32 0.35355338, %v1169_v2  ;;  %v2393_v4 = vsel %vm2344_vm11, %v1236_v1, -1e+30 }
 0x3f6   : > { %v1238_v6 = vsel %vm777_vm10, %v2393_v4, -inf }
 0x3f7   : > { %1239 = vmax.xlane.f32.xlu2 %v1238_v6  ;;  %v1174_v8 = vsel %vm2344_vm11, %v1173_v3, -1e+30 }
 0x3f8   : > { %v1175_v10 = vsel %vm777_vm10, %v1174_v8, -inf }
 0x3f9   : > { %1176 = vmax.xlane.f32.xlu0 %v1175_v10 }
 0x3fa   : > { %v1234_v11 = vpop.f32.mrf.mxu3 }
 0x3fc   : > { %v1171_v12 = vpop.f32.mrf.mxu0 }
 0x400   : > { %999 = vrot.lane.b32.xlu1 %v2319_v51, %s2121_s22 }
 0x40d   : > { %935 = vrot.lane.b32.xlu0 %v2319_v51, %s2122_s24 }
 0x40f   : > { %871 = vrot.lane.b32.xlu2 %v2319_v51, %s2123_s15 }
 0x437   : > { %930 = vadd.xlane.f32.xlu0 %v929_v17 }
 0x44a   : > { %v989_v19 = vpop.xlane.xlu0 %988 }
 0x44b   : > { %v990_v20 = vsub.f32 %v986_v47, %v989_v19 }
 0x44d   : > { %v991_v21 = vmul.f32 1.442695, %v990_v20 }
 0x44f   : > { %2016 = vpow2.f32 %v991_v21 }
 0x455   : > { %v2408_v22 = vpop.eup %2016 }
 0x456   : > { %v993_v23 = vsel %vm777_vm10, %v2408_v22, 0.0 }
 0x457   : > { %994 = vadd.xlane.f32.xlu1 %v993_v23 }
 0x45a   : > { %v1114_v51 = vpop.xlane.xlu1 %1113 }
 0x45b   : > { %v1115_v25 = vsub.f32 %v1111_v58, %v1114_v51 }
 0x45c   : > { %v1055_v27 = vpop.xlane.xlu0 %1054 }
 0x45d   : > { %v1116_v28 = vmul.f32 1.442695, %v1115_v25  ;;  %v1056_v29 = vsub.f32 %v1052_v60, %v1055_v27 }
 0x45f   : > { %2018 = vpow2.f32 %v1116_v28  ;;  %v1057_v31 = vmul.f32 1.442695, %v1056_v29  ;;  %860 = vmax.xlane.f32.xlu1 %v859_v30 }
 0x461   : > { %2020 = vpow2.f32 %v1057_v31 }
 0x465   : > { %v2415_v32 = vpop.eup %2018 }
 0x466   : > { %v1118_v33 = vsel %vm777_vm10, %v2415_v32, 0.0 }
 0x467   : > { %v2419_v34 = vpop.eup %2020  ;;  %1119 = vadd.xlane.f32.xlu2 %v1118_v33 }
 0x468   : > { %v1059_v9 = vsel %vm777_vm10, %v2419_v34, 0.0 }
 0x469   : > { %1060 = vadd.xlane.f32.xlu0 %v1059_v9 }
 0x46a   : > { %v1240_v35 = vpop.xlane.xlu2 %1239 }
 0x46b   : > { %v1241_v59 = vsub.f32 %v2393_v4, %v1240_v35 }
 0x46c   : > { %v1177_v36 = vpop.xlane.xlu0 %1176 }
 0x46d   : > { %v1178_v37 = vsub.f32 %v1174_v8, %v1177_v36  ;;  %v1242_v60 = vmul.f32 1.442695, %v1241_v59 }
 0x46f   : > { %v1179_v38 = vmul.f32 1.442695, %v1178_v37 }
 0x471   : > { %2022 = vpow2.f32 %v1179_v38 }
 0x472   : > { %v872_v39 = vpop.permute.xlu2 %871  ;;  %v1000_v40 = vpop.permute.xlu1 %999 }
 0x473   : > { %v877_v41 = vsel %vm816_vm9, %v872_v39, 0  ;;  %v1005_v42 = vsel %vm816_vm9, %v1000_v40, 0 }
 0x474   : > { %886 = vmatpush.bf16.msra.mxu2 %v877_v41 }
 0x477   : > { %v2425_v43 = vpop.eup %2022 }
 0x478   : > { %1014 = vmatpush.bf16.msrb.mxu2 %v1005_v42  ;;  %1124 = vrot.lane.b32.xlu1 %v2332_v56, %s2123_s15  ;;  %v1181_v44 = vsel %vm777_vm10, %v2425_v43, 0.0 }
 0x479   : > { %1182 = vadd.xlane.f32.xlu2 %v1181_v44 }
 0x47d   : > { %1187 = vrot.lane.b32.xlu0 %v2332_v56, %s2122_s24 }
 0x47f   : > { %v936_v45 = vpop.permute.xlu0 %935 }
 0x480   : > { %v941_v46 = vsel %vm816_vm9, %v936_v45, 0 }
 0x481   : > { %950 = vmatpush.bf16.msrb.mxu1 %v941_v46 }
 0x491   : > { %1250 = vrot.lane.b32.xlu2 %v2332_v56, %s2121_s22  ;;  %s2601_s22 = sld [smem:[#allocation12_spill]] (!%p1917_p6) }
 0x4aa   : > { %v931_v47 = vpop.xlane.xlu0 %930 }
 0x4ab   : > { %2024 = vrcp.f32 %v931_v47 }
 0x4b1   : > { %v2025_v48 = vpop.eup %2024 }
 0x4b2   : > { %v933_v49 = vmul.f32 %v2025_v48, %v2015_v16  ;;  %v1938_v48 = vld [vmem:[%s2251_s25 + $0x8] sm:$0xff] }
 0x4b3   : > { %1304 = vmatpush.bf16.msra.mxu0 %v1938_v48 }
 0x4b4   : > { %v934_v50 = vpack.c.bf16 %v933_v49, %v933_v49 }
 0x4b6   : > { %1854 = vmatmul.msk.bf16.vlgmr.msrb.gmra.mxu1 %vm777_vm10, %v934_v50 }
 0x4ca   : > { %v995_v52 = vpop.xlane.xlu1 %994 }
 0x4d2   : > { %v861_v53 = vpop.xlane.xlu1 %860 }
 0x4d3   : > { %v862_v54 = vsub.f32 %v858_v26, %v861_v53 }
 0x4d5   : > { %v863_v55 = vmul.f32 1.442695, %v862_v54 }
 0x4d7   : > { %2026 = vpow2.f32 %v863_v55 }
 0x4d8   : > { %2028 = vpow2.f32 %v1242_v60 }
 0x4da   : > { %v1120_v6 = vpop.xlane.xlu2 %1119 }
 0x4dc   : > { %v1061_v10 = vpop.xlane.xlu0 %1060 }
 0x4dd   : > { %v2027_v57 = vpop.eup %2026 }
 0x4de   : > { %v865_v58 = vsel %vm777_vm10, %v2027_v57, 0.0  ;;  %v2029_v61 = vpop.eup %2028 }
 0x4df   : > { %866 = vadd.xlane.f32.xlu1 %v865_v58  ;;  %v1244_v62 = vsel %vm777_vm10, %v2029_v61, 0.0  ;;  %v2000_v58 = vld [vmem:[%s644_s20] ss:$0 sm:$0xff] }
 0x4ea   : > { %v1125_v1 = vpop.permute.xlu1 %1124 }
 0x4eb   : > { %v1130_v4 = vsel %vm816_vm9, %v1125_v1, 0 }
 0x4ec   : > { %v1183_v11 = vpop.xlane.xlu2 %1182 }
 0x4ef   : > { %v1188_v16 = vpop.permute.xlu0 %1187 }
 0x4f0   : > { %v1193_v23 = vsel %vm816_vm9, %v1188_v16, 0 }
 0x4f4   : > { %v1251_v19 = vpop.permute.xlu2 %1250 }
 0x4f5   : > { %v1256_v51 = vsel %vm816_vm9, %v1251_v19, 0 }
 0x4f8   : > { %1065 = vrot.lane.b32.xlu1 %v2332_v56, %s2114_s27  ;;  %s2126_s27 = smov 24  }
 0x522   : > { %1245 = vadd.xlane.f32.xlu1 %v1244_v62 }
 0x533   : > { %v952_v63 = vpop.f32.mrf.mxu1 }
 0x534   : > { %957 = vrot.lane.b32.xlu2 %v952_v63, %s2124_s19 }
 0x53b   : > { %v954_v0 = vpop.f32.mrf.mxu1 }
 0x552   : > { %v867_v2 = vpop.xlane.xlu1 %866 }
 0x553   : > { %2030 = vrcp.f32 %v867_v2 }
 0x554   : > { %2032 = vrcp.f32 %v995_v52  ;;  %v1937_v52 = vld [vmem:[%s2251_s25] sm:$0xff] }
 0x555   : > { %2034 = vrcp.f32 %v1061_v10  ;;  %1305 = vmatpush.bf16.msra.mxu0 %v1937_v52  ;;  %v1939_v10 = vld [vmem:[%s2264_s3] sm:$0xff] }
 0x556   : > { %2036 = vrcp.f32 %v1120_v6 }
 0x557   : > { %2038 = vrcp.f32 %v1183_v11 }
 0x559   : > { %v2031_v3 = vpop.eup %2030 }
 0x55a   : > { %v869_v8 = vmul.f32 %v2031_v3, %v2027_v57  ;;  %v2033_v12 = vpop.eup %2032 }
 0x55b   : > { %v2035_v13 = vpop.eup %2034  ;;  %v997_v14 = vmul.f32 %v2033_v12, %v2408_v22 }
 0x55c   : > { %v870_v56 = vpack.c.bf16 %v869_v8, %v869_v8  ;;  %v1063_v15 = vmul.f32 %v2035_v13, %v2419_v34  ;;  %v2037_v22 = vpop.eup %2036 }
 0x55d   : > { %v998_v21 = vpack.c.bf16 %v997_v14, %v997_v14  ;;  %v2039_v25 = vpop.eup %2038  ;;  %v1122_v26 = vmul.f32 %v2037_v22, %v2415_v32 }
 0x55e   : > { %1852 = vmatmul.msk.bf16.vlgmr.msra.gmra.mxu2 %vm777_vm10, %v870_v56  ;;  %v1064_v24 = vpack.c.bf16 %v1063_v15, %v1063_v15  ;;  %v1185_v27 = vmul.f32 %v2039_v25, %v2425_v43 }
 0x55f   : > { %1139 = vmatpush.bf16.msra.mxu2 %v1130_v4  ;;  %v1123_v28 = vpack.c.bf16 %v1122_v26, %v1122_v26  ;;  %v2001_v26 = vld [vmem:[%s647_s12] ss:$0 sm:$0xff] }
 0x560   : > { %v1186_v29 = vpack.c.bf16 %v1185_v27, %v1185_v27 }
 0x56a   : > { %v1066_v17 = vpop.permute.xlu1 %1065 }
 0x56b   : > { %v1071_v20 = vsel %vm816_vm9, %v1066_v17, 0 }
 0x56c   : > { %1080 = vmatpush.bf16.msra.mxu1 %v1071_v20 }
 0x56e   : > { %1856 = vmatmul.msk.bf16.vlgmr.msrb.gmra.mxu2 %vm777_vm10, %v998_v21 }
 0x56f   : > { %1265 = vmatpush.bf16.msrb.mxu2 %v1256_v51  ;;  %1858 = vmatmul.msk.bf16.vlgmr.msra.gmra.mxu1 %vm777_vm10, %v1064_v24 }
 0x570   : > { %1202 = vmatpush.bf16.msrb.mxu1 %v1193_v23 }
 0x57e   : > { %1860 = vmatmul.msk.bf16.vlgmr.msra.gmra.mxu2 %vm777_vm10, %v1123_v28 }
 0x57f   : > { %1862 = vmatmul.msk.bf16.vlgmr.msrb.gmra.mxu1 %vm777_vm10, %v1186_v29 }
 0x58e   : > { %v958_v45 = vpop.permute.xlu2 %957 }
 0x595   : > { %v1246_v30 = vpop.xlane.xlu1 %1245 }
 0x596   : > { %2040 = vrcp.f32 %v1246_v30 }
 0x59c   : > { %v2041_v31 = vpop.eup %2040 }
 0x59d   : > { %v1248_v33 = vmul.f32 %v2041_v31, %v2029_v61 }
 0x59f   : > { %v1249_v34 = vpack.c.bf16 %v1248_v33, %v1248_v33 }
 0x5a1   : > { %1864 = vmatmul.msk.bf16.vlgmr.msrb.gmra.mxu2 %vm777_vm10, %v1249_v34  ;;  %v2002_v34 = vld [vmem:[%s655_s21] ss:$0 sm:$0xff] }
 0x5e1   : > { %v888_v9 = vpop.f32.mrf.mxu2 }
 0x5e2   : > { %893 = vrot.lane.b32.xlu0 %v888_v9, %s2125_s26 }
 0x5e9   : > { %v890_v32 = vpop.f32.mrf.mxu2 }
 0x5ec   : > { %v1082_v35 = vpop.f32.mrf.mxu1 }
 0x5ed   : > { %1086 = vst.msk [vmem:[#allocation3 + $0x8] sm:$0xff] %vm777_vm10, %v1082_v35  ;;  %v1948_v35 = vld [vmem:[%s2274_s13 + $0x38] sm:$0xff] }
 0x5ee   : > { %1555 = vmatpush.bf16.msrb.mxu3 %v1948_v35 }
 0x5f1   : > { %v1016_v36 = vpop.f32.mrf.mxu2 }
 0x5f2   : > { %1021 = vrot.lane.b32.xlu2 %v1016_v36, %s2126_s27 }
 0x5f4   : > { %v1084_v37 = vpop.f32.mrf.mxu1 }
 0x5f9   : > { %v1018_v38 = vpop.f32.mrf.mxu2 }
 0x5fa   : > { %v1947_v38 = vld [vmem:[%s2274_s13 + $0x30] sm:$0xff] }
 0x5fb   : > { %1556 = vmatpush.bf16.msrb.mxu3 %v1947_v38 }
 0x5fc   : > { %v1204_v39 = vpop.f32.mrf.mxu1 }
 0x5fd   : > { %1209 = vrot.lane.b32.xlu0 %v1204_v39, %s2124_s19  ;;  %s2602_s19 = sld [smem:[#allocation14_spill]] (!%p1917_p6) }
 0x601   : > { %v1141_v40 = vpop.f32.mrf.mxu2 }
 0x602   : > { %1146 = vrot.lane.b32.xlu1 %v1141_v40, %s2125_s26 }
 0x604   : > { %v1206_v41 = vpop.f32.mrf.mxu1 }
 0x609   : > { %v1143_v42 = vpop.f32.mrf.mxu2 }
 0x624   : > { %v1267_v43 = vpop.f32.mrf.mxu2 }
 0x625   : > { %1272 = vrot.lane.b32.xlu0 %v1267_v43, %s2126_s27 }
 0x62c   : > { %v1269_v44 = vpop.f32.mrf.mxu2 }
 0x62d   : > { %v1946_v44 = vld [vmem:[%s2274_s13 + $0x28] sm:$0xff] }
 0x62e   : > { %1557 = vmatpush.bf16.msrb.mxu3 %v1946_v44 }
 0x64c   : > { %v1022_v47 = vpop.permute.xlu2 %1021 }
 0x654   : > { %v894_v46 = vpop.permute.xlu0 %893 }
 0x655   : > { %897 = vst.msk [vmem:[#allocation3] sm:$0xff] %vm896_vm12, %v894_v46 }
 0x656   : > { %961 = vst.msk [vmem:[#allocation3] sm:$0xff] %vm960_vm13, %v958_v45 }
 0x657   : > { %1025 = vst.msk [vmem:[#allocation3] sm:$0xff] %vm1024_vm14, %v1022_v47 }
 0x65e   : > { %v1276_v54 = vld [vmem:[#allocation3] sm:$0xff] }
 0x66f   : > { %v1210_v50 = vpop.permute.xlu0 %1209 }
 0x674   : > { %v1147_v49 = vpop.permute.xlu1 %1146 }
 0x675   : > { %1149 = vst.msk [vmem:[#allocation3 + $0x8] sm:$0xff] %vm896_vm12, %v1147_v49  ;;  %v1945_v49 = vld [vmem:[%s2274_s13 + $0x20] sm:$0xff] }
 0x676   : > { %1212 = vst.msk [vmem:[#allocation3 + $0x8] sm:$0xff] %vm960_vm13, %v1210_v50  ;;  %1558 = vmatpush.bf16.msrb.mxu3 %v1945_v49 }
 0x697   : > { %v1273_v53 = vpop.permute.xlu0 %1272 }
 0x698   : > { %1275 = vst.msk [vmem:[#allocation3 + $0x8] sm:$0xff] %vm1024_vm14, %v1273_v53 }
 0x69f   : > { %v1277_v55 = vld [vmem:[#allocation3 + $0x8] sm:$0xff] }
 0x6a0   : > { %v1278_v57 = vpack.c.bf16 %v1277_v55, %v1276_v54 }
 0x6a2   : > { %1873 = vmatmul.msk.bf16.vlgmr.msra.gmra.mxu0 %vm683_vm1, %v1278_v57  ;;  %v1944_v57 = vld [vmem:[%s2274_s13 + $0x18] sm:$0xff] }
 0x6a3   : > { %1559 = vmatpush.bf16.msrb.mxu3 %v1944_v57 }
 0x71f   : > { %v1307_v59 = vpop.f32.mrf.mxu0 }
 0x720   : > { %v1312_v60 = vadd.f32 %v1307_v59, %v2290_v5  ;;  %v1940_v5 = vld [vmem:[%s2264_s3 + $0x8] sm:$0xff] }
 0x721   : > { %1390 = vmatpush.bf16.msra.mxu1 %v1940_v5 }
 0x722   : > { %v2470_v61 = vadd.f32 %v2000_v58, %v1312_v60 }
 0x724   : > { %v1321_v62 = vmul.f32 %v2470_v61, %v2470_v61 }
 0x725   : > { %1391 = vmatpush.bf16.msra.mxu1 %v1939_v10 }
 0x726   : > { %v1323_v63 = vsel %vm683_vm1, %v1321_v62, 0.0 }
 0x727   : > { %1324 = vadd.xlane.f32.xlu2 %v1323_v63  ;;  %v1309_v0 = vpop.f32.mrf.mxu0 }
 0x728   : > { %v1313_v1 = vadd.f32 %v1309_v0, %v2294_v7 }
 0x72a   : > { %v2476_v2 = vadd.f32 %v2000_v58, %v1313_v1 }
 0x72c   : > { %v1322_v3 = vmul.f32 %v2476_v2, %v2476_v2 }
 0x72e   : > { %v1326_v6 = vsel %vm683_vm1, %v1322_v3, 0.0  ;;  %v1943_v3 = vld [vmem:[%s2274_s13 + $0x10] sm:$0xff] }
 0x72f   : > { %1327 = vadd.xlane.f32.xlu0 %v1326_v6  ;;  %1560 = vmatpush.bf16.msrb.mxu3 %v1943_v3 }
 0x79a   : > { %v1325_v8 = vpop.xlane.xlu2 %1324 }
 0x79b   : > { %v1329_v56 = vmul.f32 %v1325_v8, %v2301_v18 }
 0x79d   : > { %v1331_v4 = vadd.f32 1e-06, %v1329_v56 }
 0x79f   : > { %2042 = vrsqrt.f32 %v1331_v4  ;;  %vm1339_vm0 = vweird.f32 %v1331_v4 }
 0x7a2   : > { %v1328_v11 = vpop.xlane.xlu0 %1327 }
 0x7a3   : > { %v1330_v7 = vmul.f32 %v1328_v11, %v2301_v18 }
 0x7a5   : > { %v2043_v12 = vpop.eup %2042  ;;  %v1332_v13 = vadd.f32 1e-06, %v1330_v7  ;;  %v1942_v7 = vld [vmem:[%s2274_s13 + $0x8] sm:$0xff] }
 0x7a6   : > { %v1334_v14 = vmul.f32 %v2043_v12, %v1331_v4  ;;  %vm1340_vm15 = vweird.f32 %v2043_v12  ;;  %1561 = vmatpush.bf16.msrb.mxu3 %v1942_v7 }
 0x7a7   : > { %2044 = vrsqrt.f32 %v1332_v13  ;;  %vm1341_vm2 = vmor %vm1339_vm0, %vm1340_vm15  ;;  %vm1349_vm4 = vweird.f32 %v1332_v13 }
 0x7a8   : > { %v1335_v15 = vmul.f32 %v2043_v12, %v1334_v14 }
 0x7aa   : > { %v1336_v16 = vmul.f32 0.5, %v1335_v15 }
 0x7ac   : > { %v1337_v17 = vsub.f32 1.5, %v1336_v16 }
 0x7ad   : > { %v2045_v19 = vpop.eup %2044 }
 0x7ae   : > { %v1344_v20 = vmul.f32 %v2045_v19, %v1332_v13  ;;  %v1338_v21 = vmul.f32 %v2043_v12, %v1337_v17  ;;  %vm1350_vm3 = vweird.f32 %v2045_v19  ;;  %v1941_v17 = vld [vmem:[%s2274_s13] sm:$0xff] }
 0x7af   : > { %vm1351_vm5 = vmor %vm1349_vm4, %vm1350_vm3  ;;  %1562 = vmatpush.bf16.msrb.mxu3 %v1941_v17 }
 0x7b0   : > { %v1345_v23 = vmul.f32 %v2045_v19, %v1344_v20  ;;  %v1342_v51 = vsel %vm1341_vm2, %v2043_v12, %v1338_v21 }
 0x7b1   : > { %v1353_v27 = vmul.f32 %v1342_v51, %v2470_v61 }
 0x7b2   : > { %v1346_v24 = vmul.f32 0.5, %v1345_v23 }
 0x7b3   : > { %v1358_v30 = vmul.f32 %v2001_v26, %v1353_v27 }
 0x7b4   : > { %v1347_v22 = vsub.f32 1.5, %v1346_v24 }
 0x7b6   : > { %v1348_v25 = vmul.f32 %v2045_v19, %v1347_v22 }
 0x7b8   : > { %v1352_v28 = vsel %vm1351_vm5, %v2045_v19, %v1348_v25 }
 0x7b9   : > { %v1354_v29 = vmul.f32 %v1352_v28, %v2476_v2 }
 0x7bb   : > { %v1359_v31 = vmul.f32 %v2001_v26, %v1354_v29 }
 0x7bd   : > { %v1360_v33 = vpack.c.bf16 %v1359_v31, %v1358_v30 }
 0x7bf   : > { %1882 = vmatmul.msk.bf16.vlgmr.msra.gmra.mxu1 %vm683_vm1, %v1360_v33 }
 0x83c   : > { %v1393_v9 = vpop.f32.mrf.mxu1 }
 0x83d   : > { %v2498_v32 = vadd.f32 %v2002_v34, %v1393_v9 }
 0x83f   : > { %v2502_v36 = vmul.f32 0.70710677, %v2498_v32 }
 0x841   : > { %v1402_v37 = vmul.f32 %v2502_v36, %v2502_v36 }
 0x843   : > { %v1403_v39 = vmin.f32 %v1402_v37, 16.0 }
 0x844   : > { %v1395_v40 = vpop.f32.mrf.mxu1 }
 0x845   : > { %v1404_v41 = vmul.f32 2.1237322e-06, %v1403_v39  ;;  %v1415_v42 = vmul.f32 3.8918573e-05, %v1403_v39  ;;  %v2507_v43 = vadd.f32 %v2002_v34, %v1395_v40 }
 0x847   : > { %v1405_v45 = vadd.f32 0.00028619796, %v1404_v41  ;;  %v1416_v46 = vadd.f32 0.001143296, %v1415_v42  ;;  %v2511_v47 = vmul.f32 0.70710677, %v2507_v43 }
 0x849   : > { %v1417_v48 = vmul.f32 %v1416_v46, %v1403_v39  ;;  %v1442_v50 = vmul.f32 %v2511_v47, %v2511_v47  ;;  %v1406_v52 = vmul.f32 %v1405_v45, %v1403_v39 }
 0x84b   : > { %v1418_v53 = vadd.f32 0.014752088, %v1417_v48  ;;  %v1443_v54 = vmin.f32 %v1442_v50, 16.0  ;;  %v1407_v60 = vadd.f32 0.0036580483, %v1406_v52 }
 0x84d   : > { %v1419_v55 = vmul.f32 %v1418_v53, %v1403_v39  ;;  %v1444_v58 = vmul.f32 2.1237322e-06, %v1443_v54  ;;  %v1455_v59 = vmul.f32 3.8918573e-05, %v1443_v54  ;;  %v1408_v8 = vmul.f32 %v1407_v60, %v1403_v39 }
 0x84f   : > { %v1420_v62 = vadd.f32 0.112945676, %v1419_v55  ;;  %v1445_v63 = vadd.f32 0.00028619796, %v1444_v58  ;;  %v1456_v0 = vadd.f32 0.001143296, %v1455_v59 }
 0x850   : > { %v1409_v13 = vadd.f32 0.05243302, %v1408_v8 }
 0x851   : > { %v1421_v1 = vmul.f32 %v1420_v62, %v1403_v39  ;;  %v1446_v6 = vmul.f32 %v1445_v63, %v1443_v54  ;;  %v1457_v5 = vmul.f32 %v1456_v0, %v1443_v54  ;;  %v1398_v63 = vmul.f32 0.5, %v2498_v32 }
 0x852   : > { %v1410_v20 = vmul.f32 %v1409_v13, %v1403_v39  ;;  %v1399_v0 = vmul.f32 0.5, %v2507_v43 }
 0x853   : > { %v1422_v56 = vadd.f32 0.4994258, %v1421_v1  ;;  %v1447_v10 = vadd.f32 0.0036580483, %v1446_v6  ;;  %v1458_v4 = vadd.f32 0.014752088, %v1457_v5 }
 0x854   : > { %v1411_v22 = vadd.f32 0.18741608, %v1410_v20 }
 0x855   : > { %v1423_v11 = vmul.f32 %v1422_v56, %v1403_v39  ;;  %v1459_v12 = vmul.f32 %v1458_v4, %v1443_v54  ;;  %v1448_v15 = vmul.f32 %v1447_v10, %v1443_v54 }
 0x856   : > { %v1412_v29 = vmul.f32 %v1411_v22, %v1403_v39 }
 0x857   : > { %v1424_v14 = vadd.f32 1.0, %v1423_v11  ;;  %v1460_v16 = vadd.f32 0.112945676, %v1459_v12  ;;  %v1449_v21 = vadd.f32 0.05243302, %v1448_v15 }
 0x858   : > { %v1413_v35 = vadd.f32 1.1283791, %v1412_v29 }
 0x859   : > { %2046 = vrcp.f32 %v1424_v14  ;;  %v1461_v19 = vmul.f32 %v1460_v16, %v1443_v54  ;;  %v1450_v26 = vmul.f32 %v1449_v21, %v1443_v54  ;;  %v1436_v31 = vand.u32 2147483648, %v1424_v14 }
 0x85a   : > { %v1434_v34 = vand.u32 2147483647, %v1424_v14  ;;  %vm1430_vm7 = vweird.f32 %v1424_v14  ;;  %v1414_v45 = vmul.f32 %v1413_v35, %v2502_v36 }
 0x85b   : > { %v1462_v23 = vadd.f32 0.4994258, %v1461_v19  ;;  %v1451_v33 = vadd.f32 0.18741608, %v1450_v26  ;;  %v1437_v40 = vor.u32 1.1754944e-38, %v1436_v31 }
 0x85c   : > { %vm1435_vm9 = vcmp.eq.f32.partialorder %v1434_v34, 8.507059e+37 }
 0x85d   : > { %v1463_v24 = vmul.f32 %v1462_v23, %v1443_v54  ;;  %v1452_v41 = vmul.f32 %v1451_v33, %v1443_v54 }
 0x85f   : > { %v2047_v51 = vpop.eup %2046  ;;  %v1464_v27 = vadd.f32 1.0, %v1463_v24  ;;  %v1453_v39 = vadd.f32 1.1283791, %v1452_v41 }
 0x860   : > { %v1426_v25 = vmul.f32 %v2047_v51, %v1424_v14  ;;  %vm1431_vm6 = vweird.f32 %v2047_v51 }
 0x861   : > { %2048 = vrcp.f32 %v1464_v27  ;;  %vm1432_vm8 = vmor %vm1430_vm7, %vm1431_vm6  ;;  %v1476_v48 = vand.u32 2147483648, %v1464_v27  ;;  %v1474_v52 = vand.u32 2147483647, %v1464_v27  ;;  %vm1470_vm11 = vweird.f32 %v1464_v27 }
 0x862   : > { %v1427_v28 = vsub.f32 1.0, %v1426_v25  ;;  %v1454_v54 = vmul.f32 %v1453_v39, %v2511_v47  ;;  %v2003_v47 = vld [vmem:[%s663_s14] ss:$0 sm:$0xff]  ;;  %s2600_s14 = sld [smem:[#allocation13_spill]] (!%p1917_p6) }
 0x863   : > { %v1477_v55 = vor.u32 1.1754944e-38, %v1476_v48  ;;  %vm1475_vm13 = vcmp.eq.f32.partialorder %v1474_v52, 8.507059e+37 }
 0x864   : > { %v1428_v30 = vmul.f32 %v2047_v51, %v1427_v28 }
 0x866   : > { %v1429_v9 = vadd.f32 %v2047_v51, %v1428_v30 }
 0x867   : > { %v2049_v37 = vpop.eup %2048 }
 0x868   : > { %v1433_v38 = vsel %vm1432_vm8, %v2047_v51, %v1429_v9  ;;  %v1466_v42 = vmul.f32 %v2049_v37, %v1464_v27  ;;  %vm1471_vm10 = vweird.f32 %v2049_v37 }
 0x869   : > { %v1438_v44 = vsel %vm1435_vm9, %v1437_v40, %v1433_v38  ;;  %vm1472_vm12 = vmor %vm1470_vm11, %vm1471_vm10 }
 0x86a   : > { %v1467_v46 = vsub.f32 1.0, %v1466_v42  ;;  %v1439_v49 = vmul.f32 %v1438_v44, %v1414_v45 }
 0x86c   : > { %v1468_v50 = vmul.f32 %v2049_v37, %v1467_v46  ;;  %v1883_v57 = vclamps-f32 %v1439_v49, 1.0 }
 0x86e   : > { %v1469_v53 = vadd.f32 %v2049_v37, %v1468_v50  ;;  %v1482_v36 = vadd.f32 1.0, %v1883_v57 }
 0x870   : > { %v1473_v58 = vsel %vm1472_vm12, %v2049_v37, %v1469_v53  ;;  %v1484_v3 = vmul.f32 %v1482_v36, %v1398_v63 }
 0x871   : > { %v1478_v59 = vsel %vm1475_vm13, %v1477_v55, %v1473_v58 }
 0x872   : > { %v1479_v60 = vmul.f32 %v1478_v59, %v1454_v54 }
 0x874   : > { %v1884_v62 = vclamps-f32 %v1479_v60, 1.0 }
 0x876   : > { %v1483_v1 = vadd.f32 1.0, %v1884_v62 }
 0x878   : > { %v1485_v6 = vmul.f32 %v1483_v1, %v1399_v0 }
 0x87a   : > { %v1486_v5 = vpack.c.bf16 %v1485_v6, %v1484_v3 }
 0x87c   : > { %1563 = vmatmul.bf16.vlgmr.msrb.gmra.mxu3 %v1486_v5 }
 0x8ff   : > { %v1564_v8 = vpop.f32.mrf.mxu3 }
 0x900   : > { %v1565_v56 = vadd.f32 %v2003_v47, %v1564_v8 }
 0x902   : > { %v1569_v10 = vadd.f32 %v1565_v56, %v2470_v61 }
 0x904   : > { %1571 = vst.msk [vmem:[#allocation2] sm:$0xff] %vm683_vm1, %v1569_v10 }
 0x907   : > { %v1566_v4 = vpop.f32.mrf.mxu3 }
 0x908   : > { %v1567_v32 = vadd.f32 %v2003_v47, %v1566_v4  ;;  %1576 = sbr.rel (%p1917_p6) target bundleno = 2609 (0xa31), region = 88 }
 0x90a   : > { %v1570_v43 = vadd.f32 %v1567_v32, %v2476_v2 }
 0x90c   : > { %1572 = vst.msk [vmem:[#allocation2 + $0x8] sm:$0xff] %vm683_vm1, %v1570_v43 }
 0x90d   : > { %v1578_v11 = vmul.f32 %v1569_v10, %v1569_v10  ;;  %v1579_v12 = vmul.f32 %v1570_v43, %v1570_v43  ;;  %v1950_v61 = vld [vmem:[%s2600_s14 + $0x8] sm:$0xff]  ;;  %v1949_v2 = vld [vmem:[%s2600_s14] sm:$0xff] }
 0x90e   : > { %1647 = vmatpush.bf16.msra.mxu0 %v1950_v61  ;;  %v2050_v34 = vld [vmem:[%s2601_s22] ss:$0 sm:$0xff] }
 0x90f   : > { %v1580_v7 = vsel %vm683_vm1, %v1578_v11, 0.0  ;;  %v1583_v13 = vsel %vm683_vm1, %v1579_v12, 0.0  ;;  %v2051_v41 = vld [vmem:[%s2602_s19] ss:$0 sm:$0xff] }
 0x910   : > { %1581 = vadd.xlane.f32.xlu0 %v1580_v7 }
 0x912   : > { %1648 = vmatpush.bf16.msra.mxu0 %v1949_v2 }
 0x918   : > { %1584 = vadd.xlane.f32.xlu0 %v1583_v13 }
 0x983   : > { %v1582_v14 = vpop.xlane.xlu0 %1581 }
 0x984   : > { %v1586_v15 = vmul.f32 %v1582_v14, %v2301_v18 }
 0x986   : > { %v1588_v16 = vadd.f32 1e-06, %v1586_v15 }
 0x988   : > { %2052 = vrsqrt.f32 %v1588_v16  ;;  %vm1596_vm15 = vweird.f32 %v1588_v16 }
 0x98b   : > { %v1585_v17 = vpop.xlane.xlu0 %1584 }
 0x98c   : > { %v1587_v19 = vmul.f32 %v1585_v17, %v2301_v18 }
 0x98e   : > { %v2053_v20 = vpop.eup %2052  ;;  %v1589_v21 = vadd.f32 1e-06, %v1587_v19 }
 0x98f   : > { %v1591_v23 = vmul.f32 %v2053_v20, %v1588_v16  ;;  %vm1597_vm14 = vweird.f32 %v2053_v20 }
 0x990   : > { %2054 = vrsqrt.f32 %v1589_v21  ;;  %vm1598_vm0 = vmor %vm1596_vm15, %vm1597_vm14  ;;  %vm1606_vm3 = vweird.f32 %v1589_v21 }
 0x991   : > { %v1592_v24 = vmul.f32 %v2053_v20, %v1591_v23 }
 0x993   : > { %v1593_v51 = vmul.f32 0.5, %v1592_v24 }
 0x995   : > { %v1594_v22 = vsub.f32 1.5, %v1593_v51 }
 0x996   : > { %v2055_v25 = vpop.eup %2054 }
 0x997   : > { %v1601_v26 = vmul.f32 %v2055_v25, %v1589_v21  ;;  %v1595_v28 = vmul.f32 %v2053_v20, %v1594_v22  ;;  %vm1607_vm2 = vweird.f32 %v2055_v25 }
 0x998   : > { %vm1608_vm4 = vmor %vm1606_vm3, %vm1607_vm2 }
 0x999   : > { %v1602_v27 = vmul.f32 %v2055_v25, %v1601_v26  ;;  %v1599_v31 = vsel %vm1598_vm0, %v2053_v20, %v1595_v28 }
 0x99a   : > { %v1610_v18 = vmul.f32 %v1599_v31, %v1569_v10 }
 0x99b   : > { %v1603_v29 = vmul.f32 0.5, %v1602_v27 }
 0x99c   : > { %v1615_v37 = vmul.f32 %v2050_v34, %v1610_v18 }
 0x99d   : > { %v1604_v30 = vsub.f32 1.5, %v1603_v29 }
 0x99f   : > { %v1605_v33 = vmul.f32 %v2055_v25, %v1604_v30 }
 0x9a1   : > { %v1609_v9 = vsel %vm1608_vm4, %v2055_v25, %v1605_v33 }
 0x9a2   : > { %v1611_v35 = vmul.f32 %v1609_v9, %v1570_v43 }
 0x9a4   : > { %v1616_v38 = vmul.f32 %v2050_v34, %v1611_v35 }
 0x9a6   : > { %v1617_v40 = vpack.c.bf16 %v1616_v38, %v1615_v37 }
 0x9a8   : > { %1926 = vmatmul.msk.bf16.vlgmr.msra.gmra.mxu0 %vm683_vm1, %v1617_v40 }
 0xa25   : > { %v1650_v42 = vpop.f32.mrf.mxu0 }
 0xa26   : > { %v1651_v44 = vadd.f32 %v2051_v41, %v1650_v42 }
 0xa28   : > { %1655 = vst [vmem:[#allocation4] sm:$0xff] %v1651_v44 }
 0xa2d   : > { %v1652_v45 = vpop.f32.mrf.mxu0 }
 0xa2e   : > { %v1653_v46 = vadd.f32 %v2051_v41, %v1652_v45 }
 0xa30   : > { %1656 = vst [vmem:[#allocation4 + $0x8] sm:$0xff] %v1653_v46 }
 0xa31 PF: > { %s2603_s27 = sld [smem:[#allocation8_spill]]  ;;  %s2127_s16 = smov [#allocation4]  }
 0xa32   : > { %s2605_s20 = sld [smem:[#allocation15_spill]]  ;;  %s1665_s12 = sshll.u32 %s2127_s16, 4  ;;  %s1666_s12 = int_to_ptr.vmem [resolvable:$true] %s1665_s12 }
 0xa33   : > { %s2128_s13 = smov 128  }
 0xa37   : > { %s2604_s28 = sadd.s32 4294967295, %s2603_s27  }
 0xa38   : > { %p1955_p7 = scmp.eq.s32.totalorder %s2604_s28, 1  ;;  %s1667_s25 = sshll.u32 %s2605_s20, 4  ;;  %s1668_s25 = int_to_ptr.hbm [resolvable:$true] %s1667_s25 }
 0xa3a   : > { %1952 = dma.vmem_to_hbm [thread:$0]  (%p1955_p7), %s1666_s12, 256, %s1668_s25, [#allocation5], %s2128_s13, %s2128_s13, %s2125_s26  }
 0xa3b   : > { %2097 = dma.done.wait (%p1955_p7), [#allocation5], 256  }
 0xa3c   : > { %2099 = vsyncadd (%p1955_p7), [#allocation5], 4294967040 }
 0xa3d PF: > { %s2606_s21 = sld [smem:[#allocation8_spill]] }
 0xa3e   : > { %s2607_s18 = sld [smem:[#allocation7_spill]] }
 0xa3f   : > { %s2608_s19 = sld [smem:[#allocation9_spill]] }
 0xa43   : > { %s26_s20 = sadd.s32 1, %s2606_s21  }
 0xa44   : > { %p23_p8 = scmp.ge.s32.totalorder %s26_s20, 4  }
 0xa46   :  { %25 = sbr.rel (!%p23_p8) target bundleno = 9 (0x9), region = 146 }
 0xa4b   :  { %1684 = vsyncpa [#allocation5], 1 }
 0xa4c   :  { %1686 = vsyncpa [#allocation5 + $0x1], 1 }

</bundles_post_ra>
